<compile_context>
chip_gen: v7x
topology: tpu7x:2x2x1
jax: 0.10.0
libtpu: 0.0.40
codegen_flags: <defaults>
</compile_context>

<pallas_src>
import functools

import numpy as np
import jax
import jax.numpy as jnp
from jax.experimental import pallas as pl
from jax.experimental.pallas import tpu as pltpu


# ----------------------------------------------------------------------------
# Pallas kernel: one padded image per grid step, fused im2col + GEMM,
# transposed (lane-dense) output.
#   x_ref : (1, Hp, Wp, C_in)      bf16   padded NHWC image
#   w_ref : (k*k, C_in, C_out)     bf16   grid-invariant, single-buffered
#   b_ref : (C_out, 1)             f32    grid-invariant, single-buffered
#   o_ref : (1, C_out, Ho*Wo)      f32    lane-dense output block
# ----------------------------------------------------------------------------
def _fused_conv_kernel(x_ref, w_ref, b_ref, o_ref, *, kernel_size, stride,
                       h_out, w_out):
    k, s = kernel_size, stride
    c_in = x_ref.shape[-1]
    c_out = o_ref.shape[1]
    r = h_out * w_out

    acc = jnp.zeros((r, c_out), jnp.float32)
    # k*k shifted (R, C_in) x (C_in, C_out) matmuls, f32 accumulation.
    # The im2col patch matrix never exists in HBM (perf feedback #1).
    for kh in range(k):
        for kw in range(k):
            if s == 1:
                xs = x_ref[0, kh:kh + h_out, kw:kw + w_out, :]
            else:
                xs = x_ref[0, pl.ds(kh, h_out, s), pl.ds(kw, w_out, s), :]
            xs = xs.reshape(r, c_in)                       # (R, C_in)
            w_kk = w_ref[kh * k + kw]                      # (C_in, C_out)
            acc = acc + jnp.dot(xs, w_kk,
                                preferred_element_type=jnp.float32)

    # Lane-dense epilogue + store (perf feedback #2): transpose once so
    # Ho*Wo (>=128) sits on the lane axis; the bias add and the store then
    # run on fully occupied vregs, and (N, C_out, Ho*Wo) reshapes to NCHW
    # for free in the wrapper.
    out_t = jnp.transpose(acc)                             # (C_out, R)
    o_ref[0] = out_t + b_ref[...]                          # bias broadcast over lanes


@functools.partial(
    jax.jit,
    static_argnames=("in_channels", "out_channels", "kernel_size", "stride",
                     "padding", "padding_mode", "h_out", "w_out"))
def _sparse_conv2d_forward(x, w_kkio, bias_col, *, in_channels, out_channels,
                           kernel_size, stride, padding, padding_mode,
                           h_out, w_out):
    N, C, H, W = x.shape
    k, s, p = kernel_size, stride, padding

    # Layout plumbing only: bf16 cast + NHWC + spatial pad of the *raw* image
    # (k^2 x smaller than the im2col patches the previous version materialized
    # in HBM).
    x = jnp.transpose(x.astype(jnp.bfloat16), (0, 2, 3, 1))      # (N, H, W, C)
    pad_mode = "wrap" if padding_mode == "circular" else "constant"
    x_pad = jnp.pad(x, ((0, 0), (p, p), (p, p), (0, 0)), mode=pad_mode)
    hp, wp = H + 2 * p, W + 2 * p
    r = h_out * w_out

    kernel = functools.partial(_fused_conv_kernel, kernel_size=k, stride=s,
                               h_out=h_out, w_out=w_out)

    out = pl.pallas_call(
        kernel,
        out_shape=jax.ShapeDtypeStruct((N, out_channels, r), jnp.float32),
        grid_spec=pltpu.PrefetchScalarGridSpec(
            num_scalar_prefetch=0,
            grid=(N,),                                       # one image / step
            in_specs=[
                pl.BlockSpec((1, hp, wp, C), lambda n: (n, 0, 0, 0)),
                # grid-invariant -> resident in VMEM, single-buffered
                pl.BlockSpec((k * k, C, out_channels), lambda n: (0, 0, 0),
                             pipeline_mode=pl.Buffered(1)),
                pl.BlockSpec((out_channels, 1), lambda n: (0, 0),
                             pipeline_mode=pl.Buffered(1)),
            ],
            out_specs=pl.BlockSpec((1, out_channels, r), lambda n: (n, 0, 0)),
        ),
        compiler_params=pltpu.CompilerParams(
            dimension_semantics=("parallel",),               # v7x: 2 TCs share batch
        ),
    )(x_pad, w_kkio, bias_col)

    # (N, C_out, Ho*Wo) -> (N, C_out, Ho, Wo): contiguous reshape, no transpose.
    return out.reshape(N, out_channels, h_out, w_out)


# ----------------------------------------------------------------------------
# sparse_support for connect_type='normal', in/out_consistent=True — used only
# by the pure-JAX reference (dense realization of the torch sparse.mm) below.
# ----------------------------------------------------------------------------
def sparse_support_normal(H_in, W_in, in_channels, out_channels,
                          kernel_size, stride, padding, padding_mode):
    H_out = (H_in + 2 * padding - kernel_size) // stride + 1
    W_out = (W_in + 2 * padding - kernel_size) // stride + 1
    rows, cols, pidx = [], [], []
    for co in range(out_channels):
        for ho in range(H_out):
            for wo in range(W_out):
                row = (co * H_out + ho) * W_out + wo
                for ci in range(in_channels):
                    for kh in range(kernel_size):
                        for kw in range(kernel_size):
                            hi = ho * stride - padding + kh
                            wi = wo * stride - padding + kw
                            if padding_mode == 'circular':
                                hi %= H_in
                                wi %= W_in
                            elif not (0 <= hi < H_in and 0 <= wi < W_in):
                                continue  # 'zeros' padding -> entry absent
                            col = (ci * H_in + hi) * W_in + wi
                            pnum = ((co * in_channels + ci) * kernel_size + kh) * kernel_size + kw
                            rows.append(row)
                            cols.append(col)
                            pidx.append(pnum)
    w_size = (out_channels * H_out * W_out, in_channels * H_in * W_in)
    return (H_out, W_out,
            np.asarray(rows, np.int32), np.asarray(cols, np.int32),
            np.asarray(pidx, np.int32), w_size)


# ----------------------------------------------------------------------------
# Module-equivalent wrapper
# ----------------------------------------------------------------------------
class SparseConv2dPallas:
    """SparseConv2d with connect_type='normal', in/out_consistent=True.

    Note: computes with bf16 operands / f32 accumulation (deliberate precision
    change vs the f32 torch sparse.mm reference).

    # TODO(synk): connect_type='shuffle'/'scatter' need utils.random_pos_channel
    # (not provided); they would use scalar-prefetched per-row column offsets
    # instead of the fixed shifted-window im2col.
    """

    def __init__(self, H_in, W_in, in_channels, out_channels, kernel_size,
                 stride=1, padding=0, padding_mode='zeros', bias=False,
                 key=None):
        self.H_in, self.W_in = H_in, W_in
        self.in_channels, self.out_channels = in_channels, out_channels
        self.kernel_size, self.stride, self.padding = kernel_size, stride, padding
        self.padding_mode = padding_mode
        if padding_mode == 'circular':
            # jnp.pad(mode='wrap') matches torch circular padding only here.
            assert padding < min(H_in, W_in), "circular padding must be < spatial size"
        self.H_out = (H_in + 2 * padding - kernel_size) // stride + 1
        self.W_out = (W_in + 2 * padding - kernel_size) // stride + 1

        key = jax.random.PRNGKey(0) if key is None else key
        kw_key, kb_key = jax.random.split(key)
        n_params = out_channels * in_channels * kernel_size * kernel_size
        fan_in = in_channels * kernel_size * kernel_size
        bound = 1.0 / np.sqrt(fan_in)
        # flattened Conv2d weight (uniform init like nn.Conv2d)
        self.weight = jax.random.uniform(kw_key, (n_params,), jnp.float32,
                                         minval=-bound, maxval=bound)
        if bias:
            self.bias = jax.random.uniform(kb_key, (out_channels,), jnp.float32,
                                           minval=-bound, maxval=bound)
        else:
            self.bias = None

        # ---- hoisted out of the per-call path ----
        # (C_out*C_in*k*k,) -> (C_out, C_in, k, k) -> (k*k, C_in, C_out), bf16
        w4 = self.weight.reshape(out_channels, in_channels,
                                 kernel_size, kernel_size)
        self._w_kkio = jnp.transpose(w4, (2, 3, 1, 0)).reshape(
            kernel_size * kernel_size, in_channels, out_channels
        ).astype(jnp.bfloat16)
        b = (self.bias if self.bias is not None
             else jnp.zeros((out_channels,), jnp.float32))
        self._bias_col = b.reshape(out_channels, 1).astype(jnp.float32)

    def __call__(self, inputs):
        N, C, H, W = inputs.shape
        assert C == self.in_channels and H == self.H_in and W == self.W_in
        return _sparse_conv2d_forward(
            inputs, self._w_kkio, self._bias_col,
            in_channels=self.in_channels, out_channels=self.out_channels,
            kernel_size=self.kernel_size, stride=self.stride,
            padding=self.padding, padding_mode=self.padding_mode,
            h_out=self.H_out, w_out=self.W_out)

    # Pure-JAX reference: the literal dense realization of the torch
    # sparse.mm forward (same bf16-operand / f32-accumulate dtypes).
    def reference(self, inputs):
        H_out, W_out, rows, cols, pidx, w_size = sparse_support_normal(
            self.H_in, self.W_in, self.in_channels, self.out_channels,
            self.kernel_size, self.stride, self.padding, self.padding_mode)
        M, K = w_size
        w_dense = jnp.zeros((M, K), jnp.float32).at[rows, cols].add(
            self.weight[pidx])
        N = inputs.shape[0]
        x_flat = inputs.reshape(N, K).astype(jnp.bfloat16)
        out = jnp.dot(x_flat, w_dense.astype(jnp.bfloat16).T,
                      preferred_element_type=jnp.float32)
        if self.bias is not None:
            out = out + jnp.repeat(self.bias, H_out * W_out)[None, :]
        return out.reshape(N, self.out_channels, H_out, W_out)


if __name__ == "__main__":
    # N=2, C_in=4, H=W=16, C_out=8, k=3, stride=1, padding=1
    # -> per grid step: 256 output rows, Kc = C_in*k*k = 36, C_out = 8,
    #    output block (8, 256) lane-dense.
    key = jax.random.PRNGKey(0)
    kx, kp = jax.random.split(key)
    x = jax.random.normal(kx, (2, 4, 16, 16), jnp.float32)

    layer = SparseConv2dPallas(H_in=16, W_in=16, in_channels=4, out_channels=8,
                               kernel_size=3, stride=1, padding=1,
                               padding_mode='zeros', bias=True, key=kp)

    out = jax.block_until_ready(layer(x))
    assert out.shape == (2, 8, 16, 16), out.shape

    ref = jax.block_until_ready(layer.reference(x))
    max_err = float(jnp.max(jnp.abs(out - ref)))
    assert jnp.allclose(out, ref, atol=2e-3, rtol=2e-3), max_err

    print("KERNEL_OK")
</pallas_src>

<mosaic_0001>
module attributes {stable_mosaic.version = 11 : i64} {
  func.func @_fused_conv_kernel(%arg0: i32, %arg1: memref<1x18x18x4xbf16, #tpu.memory_space<vmem>>, %arg2: memref<9x4x8xbf16, #tpu.memory_space<vmem>>, %arg3: memref<8x1xf32, #tpu.memory_space<vmem>>, %arg4: memref<1x8x256xf32, #tpu.memory_space<vmem>>) attributes {dimension_semantics = [#tpu.dimension_semantics<parallel>], iteration_bounds = array<i64: 2>, scalar_prefetch = 0 : i64, scratch_operands = 0 : i64, tpu.core_type = #tpu.core_type<tc>, window_params = [{transform_indices = @transform_0, window_bounds = array<i64: 1, 18, 18, 4>}, {pipeline_mode = #tpu.pipeline_mode<synchronous>, transform_indices = @transform_1, window_bounds = array<i64: 9, 4, 8>}, {pipeline_mode = #tpu.pipeline_mode<synchronous>, transform_indices = @transform_2, window_bounds = array<i64: 8, 1>}, {transform_indices = @transform_3, window_bounds = array<i64: 1, 8, 256>}]} {
    %cst = arith.constant 0.000000e+00 : f32
    %0 = vector.broadcast %cst : f32 to vector<256x8xf32>
    %c0 = arith.constant 0 : index
    %c0_0 = arith.constant 0 : index
    %c0_1 = arith.constant 0 : index
    %c0_2 = arith.constant 0 : index
    %1 = vector.load %arg1[%c0, %c0_0, %c0_1, %c0_2] : memref<1x18x18x4xbf16, #tpu.memory_space<vmem>>, vector<1x16x16x4xbf16>
    %2 = vector.shape_cast %1 : vector<1x16x16x4xbf16> to vector<16x16x4xbf16>
    %3 = vector.shape_cast %2 : vector<16x16x4xbf16> to vector<256x4xbf16>
    %c0_3 = arith.constant 0 : index
    %c0_4 = arith.constant 0 : index
    %c0_5 = arith.constant 0 : index
    %4 = vector.load %arg2[%c0_3, %c0_4, %c0_5] : memref<9x4x8xbf16, #tpu.memory_space<vmem>>, vector<1x4x8xbf16>
    %5 = vector.shape_cast %4 : vector<1x4x8xbf16> to vector<4x8xbf16>
    %cst_6 = arith.constant dense<0.000000e+00> : vector<256x8xf32>
    %6 = tpu.matmul %3, %5, %cst_6 {dimension_numbers = #tpu.dot_dimension_numbers<[1], [0], [0], [1], [0, 0, 1, 1], [], []>} : vector<256x4xbf16>, vector<4x8xbf16>, vector<256x8xf32> -> vector<256x8xf32>
    %7 = arith.addf %0, %6 : vector<256x8xf32>
    %c0_7 = arith.constant 0 : index
    %c0_8 = arith.constant 0 : index
    %c1 = arith.constant 1 : index
    %c0_9 = arith.constant 0 : index
    %8 = vector.load %arg1[%c0_7, %c0_8, %c1, %c0_9] : memref<1x18x18x4xbf16, #tpu.memory_space<vmem>>, vector<1x16x16x4xbf16>
    %9 = vector.shape_cast %8 : vector<1x16x16x4xbf16> to vector<16x16x4xbf16>
    %10 = vector.shape_cast %9 : vector<16x16x4xbf16> to vector<256x4xbf16>
    %c1_10 = arith.constant 1 : index
    %c0_11 = arith.constant 0 : index
    %c0_12 = arith.constant 0 : index
    %11 = vector.load %arg2[%c1_10, %c0_11, %c0_12] : memref<9x4x8xbf16, #tpu.memory_space<vmem>>, vector<1x4x8xbf16>
    %12 = vector.shape_cast %11 : vector<1x4x8xbf16> to vector<4x8xbf16>
    %cst_13 = arith.constant dense<0.000000e+00> : vector<256x8xf32>
    %13 = tpu.matmul %10, %12, %cst_13 {dimension_numbers = #tpu.dot_dimension_numbers<[1], [0], [0], [1], [0, 0, 1, 1], [], []>} : vector<256x4xbf16>, vector<4x8xbf16>, vector<256x8xf32> -> vector<256x8xf32>
    %14 = arith.addf %7, %13 : vector<256x8xf32>
    %c0_14 = arith.constant 0 : index
    %c0_15 = arith.constant 0 : index
    %c2 = arith.constant 2 : index
    %c0_16 = arith.constant 0 : index
    %15 = vector.load %arg1[%c0_14, %c0_15, %c2, %c0_16] : memref<1x18x18x4xbf16, #tpu.memory_space<vmem>>, vector<1x16x16x4xbf16>
    %16 = vector.shape_cast %15 : vector<1x16x16x4xbf16> to vector<16x16x4xbf16>
    %17 = vector.shape_cast %16 : vector<16x16x4xbf16> to vector<256x4xbf16>
    %c2_17 = arith.constant 2 : index
    %c0_18 = arith.constant 0 : index
    %c0_19 = arith.constant 0 : index
    %18 = vector.load %arg2[%c2_17, %c0_18, %c0_19] : memref<9x4x8xbf16, #tpu.memory_space<vmem>>, vector<1x4x8xbf16>
    %19 = vector.shape_cast %18 : vector<1x4x8xbf16> to vector<4x8xbf16>
    %cst_20 = arith.constant dense<0.000000e+00> : vector<256x8xf32>
    %20 = tpu.matmul %17, %19, %cst_20 {dimension_numbers = #tpu.dot_dimension_numbers<[1], [0], [0], [1], [0, 0, 1, 1], [], []>} : vector<256x4xbf16>, vector<4x8xbf16>, vector<256x8xf32> -> vector<256x8xf32>
    %21 = arith.addf %14, %20 : vector<256x8xf32>
    %c0_21 = arith.constant 0 : index
    %c1_22 = arith.constant 1 : index
    %c0_23 = arith.constant 0 : index
    %c0_24 = arith.constant 0 : index
    %22 = vector.load %arg1[%c0_21, %c1_22, %c0_23, %c0_24] : memref<1x18x18x4xbf16, #tpu.memory_space<vmem>>, vector<1x16x16x4xbf16>
    %23 = vector.shape_cast %22 : vector<1x16x16x4xbf16> to vector<16x16x4xbf16>
    %24 = vector.shape_cast %23 : vector<16x16x4xbf16> to vector<256x4xbf16>
    %c3 = arith.constant 3 : index
    %c0_25 = arith.constant 0 : index
    %c0_26 = arith.constant 0 : index
    %25 = vector.load %arg2[%c3, %c0_25, %c0_26] : memref<9x4x8xbf16, #tpu.memory_space<vmem>>, vector<1x4x8xbf16>
    %26 = vector.shape_cast %25 : vector<1x4x8xbf16> to vector<4x8xbf16>
    %cst_27 = arith.constant dense<0.000000e+00> : vector<256x8xf32>
    %27 = tpu.matmul %24, %26, %cst_27 {dimension_numbers = #tpu.dot_dimension_numbers<[1], [0], [0], [1], [0, 0, 1, 1], [], []>} : vector<256x4xbf16>, vector<4x8xbf16>, vector<256x8xf32> -> vector<256x8xf32>
    %28 = arith.addf %21, %27 : vector<256x8xf32>
    %c0_28 = arith.constant 0 : index
    %c1_29 = arith.constant 1 : index
    %c1_30 = arith.constant 1 : index
    %c0_31 = arith.constant 0 : index
    %29 = vector.load %arg1[%c0_28, %c1_29, %c1_30, %c0_31] : memref<1x18x18x4xbf16, #tpu.memory_space<vmem>>, vector<1x16x16x4xbf16>
    %30 = vector.shape_cast %29 : vector<1x16x16x4xbf16> to vector<16x16x4xbf16>
    %31 = vector.shape_cast %30 : vector<16x16x4xbf16> to vector<256x4xbf16>
    %c4 = arith.constant 4 : index
    %c0_32 = arith.constant 0 : index
    %c0_33 = arith.constant 0 : index
    %32 = vector.load %arg2[%c4, %c0_32, %c0_33] : memref<9x4x8xbf16, #tpu.memory_space<vmem>>, vector<1x4x8xbf16>
    %33 = vector.shape_cast %32 : vector<1x4x8xbf16> to vector<4x8xbf16>
    %cst_34 = arith.constant dense<0.000000e+00> : vector<256x8xf32>
    %34 = tpu.matmul %31, %33, %cst_34 {dimension_numbers = #tpu.dot_dimension_numbers<[1], [0], [0], [1], [0, 0, 1, 1], [], []>} : vector<256x4xbf16>, vector<4x8xbf16>, vector<256x8xf32> -> vector<256x8xf32>
    %35 = arith.addf %28, %34 : vector<256x8xf32>
    %c0_35 = arith.constant 0 : index
    %c1_36 = arith.constant 1 : index
    %c2_37 = arith.constant 2 : index
    %c0_38 = arith.constant 0 : index
    %36 = vector.load %arg1[%c0_35, %c1_36, %c2_37, %c0_38] : memref<1x18x18x4xbf16, #tpu.memory_space<vmem>>, vector<1x16x16x4xbf16>
    %37 = vector.shape_cast %36 : vector<1x16x16x4xbf16> to vector<16x16x4xbf16>
    %38 = vector.shape_cast %37 : vector<16x16x4xbf16> to vector<256x4xbf16>
    %c5 = arith.constant 5 : index
    %c0_39 = arith.constant 0 : index
    %c0_40 = arith.constant 0 : index
    %39 = vector.load %arg2[%c5, %c0_39, %c0_40] : memref<9x4x8xbf16, #tpu.memory_space<vmem>>, vector<1x4x8xbf16>
    %40 = vector.shape_cast %39 : vector<1x4x8xbf16> to vector<4x8xbf16>
    %cst_41 = arith.constant dense<0.000000e+00> : vector<256x8xf32>
    %41 = tpu.matmul %38, %40, %cst_41 {dimension_numbers = #tpu.dot_dimension_numbers<[1], [0], [0], [1], [0, 0, 1, 1], [], []>} : vector<256x4xbf16>, vector<4x8xbf16>, vector<256x8xf32> -> vector<256x8xf32>
    %42 = arith.addf %35, %41 : vector<256x8xf32>
    %c0_42 = arith.constant 0 : index
    %c2_43 = arith.constant 2 : index
    %c0_44 = arith.constant 0 : index
    %c0_45 = arith.constant 0 : index
    %43 = vector.load %arg1[%c0_42, %c2_43, %c0_44, %c0_45] : memref<1x18x18x4xbf16, #tpu.memory_space<vmem>>, vector<1x16x16x4xbf16>
    %44 = vector.shape_cast %43 : vector<1x16x16x4xbf16> to vector<16x16x4xbf16>
    %45 = vector.shape_cast %44 : vector<16x16x4xbf16> to vector<256x4xbf16>
    %c6 = arith.constant 6 : index
    %c0_46 = arith.constant 0 : index
    %c0_47 = arith.constant 0 : index
    %46 = vector.load %arg2[%c6, %c0_46, %c0_47] : memref<9x4x8xbf16, #tpu.memory_space<vmem>>, vector<1x4x8xbf16>
    %47 = vector.shape_cast %46 : vector<1x4x8xbf16> to vector<4x8xbf16>
    %cst_48 = arith.constant dense<0.000000e+00> : vector<256x8xf32>
    %48 = tpu.matmul %45, %47, %cst_48 {dimension_numbers = #tpu.dot_dimension_numbers<[1], [0], [0], [1], [0, 0, 1, 1], [], []>} : vector<256x4xbf16>, vector<4x8xbf16>, vector<256x8xf32> -> vector<256x8xf32>
    %49 = arith.addf %42, %48 : vector<256x8xf32>
    %c0_49 = arith.constant 0 : index
    %c2_50 = arith.constant 2 : index
    %c1_51 = arith.constant 1 : index
    %c0_52 = arith.constant 0 : index
    %50 = vector.load %arg1[%c0_49, %c2_50, %c1_51, %c0_52] : memref<1x18x18x4xbf16, #tpu.memory_space<vmem>>, vector<1x16x16x4xbf16>
    %51 = vector.shape_cast %50 : vector<1x16x16x4xbf16> to vector<16x16x4xbf16>
    %52 = vector.shape_cast %51 : vector<16x16x4xbf16> to vector<256x4xbf16>
    %c7 = arith.constant 7 : index
    %c0_53 = arith.constant 0 : index
    %c0_54 = arith.constant 0 : index
    %53 = vector.load %arg2[%c7, %c0_53, %c0_54] : memref<9x4x8xbf16, #tpu.memory_space<vmem>>, vector<1x4x8xbf16>
    %54 = vector.shape_cast %53 : vector<1x4x8xbf16> to vector<4x8xbf16>
    %cst_55 = arith.constant dense<0.000000e+00> : vector<256x8xf32>
    %55 = tpu.matmul %52, %54, %cst_55 {dimension_numbers = #tpu.dot_dimension_numbers<[1], [0], [0], [1], [0, 0, 1, 1], [], []>} : vector<256x4xbf16>, vector<4x8xbf16>, vector<256x8xf32> -> vector<256x8xf32>
    %56 = arith.addf %49, %55 : vector<256x8xf32>
    %c0_56 = arith.constant 0 : index
    %c2_57 = arith.constant 2 : index
    %c2_58 = arith.constant 2 : index
    %c0_59 = arith.constant 0 : index
    %57 = vector.load %arg1[%c0_56, %c2_57, %c2_58, %c0_59] : memref<1x18x18x4xbf16, #tpu.memory_space<vmem>>, vector<1x16x16x4xbf16>
    %58 = vector.shape_cast %57 : vector<1x16x16x4xbf16> to vector<16x16x4xbf16>
    %59 = vector.shape_cast %58 : vector<16x16x4xbf16> to vector<256x4xbf16>
    %c8 = arith.constant 8 : index
    %c0_60 = arith.constant 0 : index
    %c0_61 = arith.constant 0 : index
    %60 = vector.load %arg2[%c8, %c0_60, %c0_61] : memref<9x4x8xbf16, #tpu.memory_space<vmem>>, vector<1x4x8xbf16>
    %61 = vector.shape_cast %60 : vector<1x4x8xbf16> to vector<4x8xbf16>
    %cst_62 = arith.constant dense<0.000000e+00> : vector<256x8xf32>
    %62 = tpu.matmul %59, %61, %cst_62 {dimension_numbers = #tpu.dot_dimension_numbers<[1], [0], [0], [1], [0, 0, 1, 1], [], []>} : vector<256x4xbf16>, vector<4x8xbf16>, vector<256x8xf32> -> vector<256x8xf32>
    %63 = arith.addf %56, %62 : vector<256x8xf32>
    %64 = tpu.transpose %63, [1, 0] : vector<256x8xf32> -> vector<8x256xf32>
    %c0_63 = arith.constant 0 : index
    %c0_64 = arith.constant 0 : index
    %65 = vector.load %arg3[%c0_63, %c0_64] : memref<8x1xf32, #tpu.memory_space<vmem>>, vector<8x1xf32>
    %66 = vector.broadcast %65 : vector<8x1xf32> to vector<8x256xf32>
    %67 = arith.addf %64, %66 : vector<8x256xf32>
    %c0_65 = arith.constant 0 : index
    %c0_66 = arith.constant 0 : index
    %c0_67 = arith.constant 0 : index
    %68 = vector.load %arg4[%c0_65, %c0_66, %c0_67] : memref<1x8x256xf32, #tpu.memory_space<vmem>>, vector<1x8x256xf32>
    %69 = vector.shape_cast %68 : vector<1x8x256xf32> to vector<8x256xf32>
    %70 = vector.shape_cast %67 : vector<8x256xf32> to vector<1x8x256xf32>
    tpu.vector_store %arg4[%c0_65, %c0_66, %c0_67], %70 {strides = array<i32>} : memref<1x8x256xf32, #tpu.memory_space<vmem>>, vector<1x8x256xf32>,
    return
  }
  func.func @transform_0(%arg0: i32) -> (i32, i32, i32, i32) {
    %c0_i32 = arith.constant 0 : i32
    %c0_i32_0 = arith.constant 0 : i32
    %c0_i32_1 = arith.constant 0 : i32
    %c0_i32_2 = arith.constant 0 : i32
    return %arg0, %c0_i32, %c0_i32_0, %c0_i32_1 : i32, i32, i32, i32
  }
  func.func @transform_1(%arg0: i32) -> (i32, i32, i32) {
    %c0_i32 = arith.constant 0 : i32
    %c0_i32_0 = arith.constant 0 : i32
    %c0_i32_1 = arith.constant 0 : i32
    %c0_i32_2 = arith.constant 0 : i32
    return %c0_i32, %c0_i32_0, %c0_i32_1 : i32, i32, i32
  }
  func.func @transform_2(%arg0: i32) -> (i32, i32) {
    %c0_i32 = arith.constant 0 : i32
    %c0_i32_0 = arith.constant 0 : i32
    %c0_i32_1 = arith.constant 0 : i32
    return %c0_i32, %c0_i32_0 : i32, i32
  }
  func.func @transform_3(%arg0: i32) -> (i32, i32, i32) {
    %c0_i32 = arith.constant 0 : i32
    %c0_i32_0 = arith.constant 0 : i32
    %c0_i32_1 = arith.constant 0 : i32
    return %arg0, %c0_i32, %c0_i32_0 : i32, i32, i32
  }
}

</mosaic_0001>

<bundles_post_ra>
// kernel: _sparse_conv2d_forward.1
= control target key start
LH: loop header
LB: loop body
LE: loop exit
PB: predicated region body
PF: predicated region fallthrough
CT: control target
= control target key end

     0   :  { %s6280_s12 = smov 0   ;;  %s8009_s0 = inlined_call_operand.vmem [shape: bf16[2,18,18,4], index: 0, kind: input, shape index: {}]   ;;  %s8010_s1 = inlined_call_operand.vmem [shape: bf16[9,4,8], index: 1, kind: input, shape index: {}]   ;;  %s8011_s2 = inlined_call_operand.vmem [shape: f32[8,1], index: 2, kind: input, shape index: {}]   ;;  %s8012_s3 = inlined_call_operand.vmem [shape: f32[2,8,256], index: 3, kind: output, shape index: {}]  }
   0x1 LB: > { %s4860_s13 = sadd.s32 4294967295, %s6257_s12   ;;  %p4864_p0 = scmp.ge.s32.totalorder %s6257_s12, 1  ;;  %s6257_s12 = sphi %s6280_s12, %s13_s12  }
   0x2   : > { %p137_p1 = scmp.lt.s32.totalorder %s6257_s12, 3 }
   0x4   : > { %p138_p2 = pnand %p4864_p0, %p137_p1 }
   0x6   : > { %141 = sbr.rel (%p138_p2) target bundleno = 688 (0x2b0), region = 32 }
   0xd   : > { %v4868_v0 = vld [vmem:[%s8010_s1 + $0x2] sm:$0x3]  ;;  %vm707_vm0 = vcmask 1041408   ;;  %v5095_v1 = vld [vmem:[%s8010_s1 + $0x8] sm:$0x3]  ;;  %p161_p3 = scmp.lt.s32.totalorder %s4860_s13, 1 }
   0xe   : > { %6124 = vmatprep.subr.msk.bf16.mxu1 %vm707_vm0, %v4868_v0  ;;  %6128 = vmatprep.subr.msk.bf16.mxu0 %vm707_vm0, %v5095_v1  ;;  %v709_v2 = vsel %vm707_vm0, %v4868_v0, 0  ;;  %v6298_v3 = vsel %vm707_vm0, %v5095_v1, 0  ;;  %v204_v4 = vld [vmem:[%s8010_s1] sm:$0x3]  ;;  %v5160_v5 = vld [vmem:[%s8010_s1 + $0xa] sm:$0x3] }
   0xf   : > { %8026 = vst [vmem:[#allocation2_spill] sm:$0xff] %v6298_v3  ;;  %5561 = vmatpush3.bf16.msra.mxu1 %v709_v2  ;;  %5697 = vmatpush3.bf16.msra.mxu0 %v6298_v3  ;;  %s8081_s13 = smov (!%p161_p3, %s4860_s13), 1  ;;  %vm221_vm1 = vsmask.f32 3328  ;;  %vm222_vm2 = vsmask.f32 7440 }
  0x10   : > { %6125 = vmatprep.subr.msk.bf16.mxu1 %vm707_vm0, %v204_v4  ;;  %6130 = vmatprep.subr.msk.bf16.mxu0 %vm707_vm0, %v5160_v5  ;;  %s6134_s22 = smul.u32 216, %s8081_s13  ;;  %vm658_vm3 = vcmask 31744   ;;  %v6328_v17 = vsel %vm707_vm0, %v204_v4, 0  ;;  %v6334_v26 = vld [vmem:[%s8010_s1 + $0xc] sm:$0x3]  ;;  %vm6341_vm4 = vmor %vm221_vm1, %vm222_vm2  ;;  %v6347_v37 = vsel %vm707_vm0, %v5160_v5, 0 }
  0x11   : > { %v6351_v41 = vsel %vm707_vm0, %v6334_v26, 0  ;;  %vm1212_vm5 = vcmask 1042432   ;;  %vm1213_vm6 = vcmask 1046532   ;;  %s5406_s17 = sshll.u32 %s8081_s13, 4 }
  0x12   : > { %s6315_s25 = scalar_lea.vmem %s8009_s0, %s6134_s22  ;;  %vm6567_vm7 = vmor %vm1212_vm5, %vm1213_vm6  ;;  %s170_s20 = scalar_lea.vmem %s8012_s3, %s5406_s17 }
  0x13   : > { %v172_v6 = vld [vmem:[%s6315_s25] sm:$0xf]  ;;  %v173_v7 = vld [vmem:[%s6315_s25 + $0x4] sm:$0xf]  ;;  %v205_v8 = vld [vmem:[%s6315_s25 + $0x8] sm:$0x1] }
  0x14   : > { %v225_v9 = vshrl.u32 %v172_v6, 16  ;;  %v228_v10 = vshll.u32 %v172_v6, 16  ;;  %v234_v11 = vshll.u32 %v173_v7, 16  ;;  %v238_v12 = vshrl.u32 %v173_v7, 16  ;;  %v5047_v13 = vld [vmem:[%s6315_s25 + $0xc] sm:$0xf] }
  0x15   : > { %v244_v14 = vshll.u32 %v205_v8, 16  ;;  %v6322_v15 = vld [vmem:[%s6315_s25 + $0x10] sm:$0xf]  ;;  %v6325_v16 = vld [vmem:[%s6315_s25 + $0x14] sm:$0x1]  ;;  %v2029_v23 = vshrl.u32 %v5047_v13, 16 }
  0x16   : > { %v227_v18 = vrot.slane %v225_v9, 4  ;;  %v230_v19 = vrot.slane %v228_v10, 5  ;;  %v236_v20 = vrot.slane %v234_v11, 5  ;;  %v240_v21 = vrot.slane %v238_v12, 4  ;;  %v174_v31 = vld [vmem:[%s6315_s25 + $0xc] sm:$0xf] }
  0x17   : > { %v246_v22 = vrot.slane %v244_v14, 5  ;;  %v2032_v24 = vshll.u32 %v5047_v13, 16  ;;  %v2038_v25 = vshll.u32 %v6322_v15, 16  ;;  %v2042_v29 = vshrl.u32 %v6322_v15, 16  ;;  %v175_v36 = vld [vmem:[%s6315_s25 + $0x10] sm:$0xf] }
  0x18   : > { %v231_v27 = vor.u32 %v230_v19, %v227_v18  ;;  %v241_v28 = vor.u32 %v240_v21, %v236_v20  ;;  %v2048_v30 = vshll.u32 %v6325_v16, 16  ;;  %v2031_v33 = vrot.slane %v2029_v23, 4  ;;  %v206_v44 = vld [vmem:[%s6315_s25 + $0x14] sm:$0x1]  ;;  %v5050_v55 = vld [vmem:[%s6315_s25 + $0x18] sm:$0xf] }
  0x19   : > { %v2034_v34 = vrot.slane %v2032_v24, 5  ;;  %v2040_v35 = vrot.slane %v2038_v25, 5  ;;  %v2044_v40 = vrot.slane %v2042_v29, 4  ;;  %v249_v45 = vshrl.u32 %v174_v31, 16  ;;  %v6360_v60 = vld [vmem:[%s6315_s25 + $0x1c] sm:$0xf] }
  0x1a   : > { %v232_v38 = vrot.slane %v231_v27, 4  ;;  %v242_v39 = vrot.slane %v241_v28, 4  ;;  %v2050_v43 = vrot.slane %v2048_v30, 5  ;;  %v252_v46 = vshll.u32 %v174_v31, 16  ;;  %v6368_v1 = vld [vmem:[%s6315_s25 + $0x20] sm:$0x1] }
  0x1b   : > { %v2035_v42 = vor.u32 %v2034_v34, %v2031_v33  ;;  %v2045_v49 = vor.u32 %v2044_v40, %v2040_v35  ;;  %v258_v50 = vshll.u32 %v175_v36, 16  ;;  %v251_v53 = vrot.slane %v249_v45, 4  ;;  %v176_v18 = vld [vmem:[%s6315_s25 + $0x18] sm:$0xf]  ;;  %v177_v23 = vld [vmem:[%s6315_s25 + $0x1c] sm:$0xf] }
  0x1c   : > { %v237_v47 = vsel %vm6341_vm4, %v232_v38, %v236_v20  ;;  %v247_v48 = vsel %vm6341_vm4, %v242_v39, %v246_v22  ;;  %v254_v54 = vrot.slane %v252_v46, 5  ;;  %v262_v58 = vshrl.u32 %v175_v36, 16  ;;  %v207_v31 = vld [vmem:[%s6315_s25 + $0x20] sm:$0x1]  ;;  %v5053_v40 = vld [vmem:[%s6315_s25 + $0x24] sm:$0xf] }
  0x1d   : > { %v4869_v51 = vcombine.low %v237_v47, %v247_v48  ;;  %v2036_v52 = vrot.slane %v2035_v42, 4  ;;  %v2046_v56 = vrot.slane %v2045_v49, 4  ;;  %v260_v57 = vrot.slane %v258_v50, 5  ;;  %v6391_v46 = vld [vmem:[%s6315_s25 + $0x28] sm:$0xf] }
  0x1e   : > { %v268_v59 = vshll.u32 %v206_v44, 16  ;;  %v2772_v62 = vrot.slane %v6322_v15, 5  ;;  %v2775_v63 = vrot.slane %v6325_v16, 5  ;;  %v255_v0 = vor.u32 %v254_v54, %v251_v53  ;;  %v6400_v54 = vld [vmem:[%s6315_s25 + $0x2c] sm:$0x1] }
  0x1f   : > { %5562 = vmatprep.mubr.msk.bf16.mxu1 %vm658_vm3, %v4869_v51  ;;  %v2041_v61 = vsel %vm6341_vm4, %v2036_v52, %v2040_v35  ;;  %v2051_v2 = vsel %vm6341_vm4, %v2046_v56, %v2050_v43  ;;  %v264_v4 = vrot.slane %v262_v58, 4  ;;  %v2053_v6 = vshrl.u32 %v5050_v55, 16  ;;  %v4949_v51 = vld [vmem:[%s8010_s1 + $0x4] sm:$0x3]  ;;  %v6600_v16 = vld [vmem:[%s6315_s25 + $0x7c] sm:$0xf] }
  0x20   : > { %v270_v5 = vrot.slane %v268_v59, 5  ;;  %v5096_v7 = vcombine.low %v2041_v61, %v2051_v2  ;;  %v256_v8 = vrot.slane %v255_v0, 4  ;;  %v2056_v9 = vshll.u32 %v5050_v55, 16  ;;  %v178_v0 = vld [vmem:[%s6315_s25 + $0x24] sm:$0xf] }
  0x21   : > { %v2062_v10 = vshll.u32 %v6360_v60, 16  ;;  %v265_v11 = vor.u32 %v264_v4, %v260_v57  ;;  %v2055_v12 = vrot.slane %v2053_v6, 4  ;;  %v2066_v13 = vshrl.u32 %v6360_v60, 16 }
  0x22   : > { %v2072_v14 = vshll.u32 %v6368_v1, 16  ;;  %5698 = vmatprep.mubr.msk.bf16.mxu0 %vm658_vm3, %v5096_v7  ;;  %v261_v19 = vsel %vm6341_vm4, %v256_v8, %v260_v57  ;;  %v2058_v20 = vrot.slane %v2056_v9, 5  ;;  %v2779_v22 = vrot.slane %v6360_v60, 5  ;;  %v179_v7 = vld [vmem:[%s6315_s25 + $0x28] sm:$0xf] }
  0x23   : > { %v2064_v21 = vrot.slane %v2062_v10, 5  ;;  %v266_v24 = vrot.slane %v265_v11, 4  ;;  %v2068_v25 = vrot.slane %v2066_v13, 4  ;;  %v2782_v28 = vrot.slane %v6368_v1, 5  ;;  %v208_v13 = vld [vmem:[%s6315_s25 + $0x2c] sm:$0x1] }
  0x24   : > { %v2074_v27 = vrot.slane %v2072_v14, 5  ;;  %v2059_v29 = vor.u32 %v2058_v20, %v2055_v12  ;;  %v6384_v30 = vrot.slane %v2779_v22, 4  ;;  %v273_v33 = vshrl.u32 %v176_v18, 16 }
  0x25   : > { %v276_v34 = vshll.u32 %v176_v18, 16  ;;  %v271_v35 = vsel %vm6341_vm4, %v266_v24, %v270_v5  ;;  %v2069_v36 = vor.u32 %v2068_v25, %v2064_v21  ;;  %v282_v38 = vshll.u32 %v177_v23, 16  ;;  %v5056_v24 = vld [vmem:[%s6315_s25 + $0x30] sm:$0xf] }
  0x26   : > { %v286_v39 = vshrl.u32 %v177_v23, 16  ;;  %v4870_v42 = vcombine.low %v261_v19, %v271_v35  ;;  %v2060_v43 = vrot.slane %v2059_v29, 4  ;;  %v275_v44 = vrot.slane %v273_v33, 4  ;;  %v6420_v33 = vld [vmem:[%s6315_s25 + $0x34] sm:$0xf] }
  0x27   : > { %v278_v45 = vrot.slane %v276_v34, 5  ;;  %v2070_v47 = vrot.slane %v2069_v36, 4  ;;  %v284_v48 = vrot.slane %v282_v38, 5  ;;  %v292_v50 = vshll.u32 %v207_v31, 16 }
  0x28   : > { %v288_v49 = vrot.slane %v286_v39, 4  ;;  %5563 = vmatmul.mubr.msk.bf16.vlgmr.msra.gmra.mrb[0].mxu1 %vm658_vm3, %v4870_v42  ;;  %v2065_v52 = vsel %vm6341_vm4, %v2060_v43, %v2064_v21  ;;  %v2077_v55 = vshrl.u32 %v5053_v40, 16  ;;  %v2080_v56 = vshll.u32 %v5053_v40, 16  ;;  %v6428_v40 = vld [vmem:[%s6315_s25 + $0x38] sm:$0x1] }
  0x29   : > { %v279_v53 = vor.u32 %v278_v45, %v275_v44  ;;  %5595 = vmatpush3.bf16.msra.mxu1 %v6328_v17  ;;  %v2075_v57 = vsel %vm6341_vm4, %v2070_v47, %v2074_v27  ;;  %v294_v59 = vrot.slane %v292_v50, 5  ;;  %v2086_v61 = vshll.u32 %v6391_v46, 16 }
  0x2a   : > { %v289_v58 = vor.u32 %v288_v49, %v284_v48  ;;  %v5097_v2 = vcombine.low %v2065_v52, %v2075_v57  ;;  %v2079_v5 = vrot.slane %v2077_v55, 4  ;;  %v2082_v6 = vrot.slane %v2080_v56, 5  ;;  %6126 = vmatprep.subr.msk.bf16.mxu1 %vm707_vm0, %v4949_v51  ;;  %v180_v52 = vld [vmem:[%s6315_s25 + $0x30] sm:$0xf] }
  0x2b   : > { %v280_v4 = vrot.slane %v279_v53, 4  ;;  %v2088_v9 = vrot.slane %v2086_v61, 5  ;;  %v2090_v17 = vshrl.u32 %v6391_v46, 16  ;;  %v2096_v10 = vshll.u32 %v6400_v54, 16 }
  0x2c   : > { %v290_v8 = vrot.slane %v289_v58, 4  ;;  %5699 = vmatmul.mubr.msk.bf16.vlgmr.msra.gmra.mrb[0].mxu0 %vm658_vm3, %v5097_v2  ;;  %v2083_v12 = vor.u32 %v2082_v6, %v2079_v5  ;;  %v297_v14 = vshrl.u32 %v178_v0, 16  ;;  %v300_v18 = vshll.u32 %v178_v0, 16  ;;  %v181_v58 = vld [vmem:[%s6315_s25 + $0x34] sm:$0xf] }
  0x2d   : > { %v285_v11 = vsel %vm6341_vm4, %v280_v4, %v284_v48  ;;  %5731 = vmatpush3.bf16.msra.mxu0 %v6347_v37  ;;  %v2092_v20 = vrot.slane %v2090_v17, 4  ;;  %v2098_v21 = vrot.slane %v2096_v10, 5  ;;  %v306_v23 = vshll.u32 %v179_v7, 16  ;;  %v209_v4 = vld [vmem:[%s6315_s25 + $0x38] sm:$0x1] }
  0x2e   : > { %v295_v19 = vsel %vm6341_vm4, %v290_v8, %v294_v59  ;;  %v2084_v27 = vrot.slane %v2083_v12, 4  ;;  %v299_v29 = vrot.slane %v297_v14, 4  ;;  %v302_v31 = vrot.slane %v300_v18, 5  ;;  %6131 = vmatprep.subr.msk.bf16.mxu0 %vm707_vm0, %v6334_v26  ;;  %v5059_v12 = vld [vmem:[%s6315_s25 + $0x3c] sm:$0xf] }
  0x2f   : > { %v4871_v25 = vcombine.low %v285_v11, %v295_v19  ;;  %v2093_v34 = vor.u32 %v2092_v20, %v2088_v9  ;;  %v308_v35 = vrot.slane %v306_v23, 5  ;;  %v310_v37 = vshrl.u32 %v179_v7, 16  ;;  %v6445_v20 = vld [vmem:[%s6315_s25 + $0x40] sm:$0xf] }
  0x30   : > { %v316_v36 = vshll.u32 %v208_v13, 16  ;;  %v2089_v38 = vsel %vm6341_vm4, %v2084_v27, %v2088_v9  ;;  %v303_v39 = vor.u32 %v302_v31, %v299_v29  ;;  %v2101_v42 = vshrl.u32 %v5056_v24, 16 }
  0x31   : > { %5566 = vmatprep.mubr.msk.bf16.mxu1 %vm658_vm3, %v4871_v25  ;;  %v2104_v43 = vshll.u32 %v5056_v24, 16  ;;  %v2094_v44 = vrot.slane %v2093_v34, 4  ;;  %v312_v45 = vrot.slane %v310_v37, 4  ;;  %v2110_v26 = vshll.u32 %v6420_v33, 16  ;;  %v6450_v34 = vld [vmem:[%s6315_s25 + $0x44] sm:$0x1] }
  0x32   : > { %v318_v47 = vrot.slane %v316_v36, 5  ;;  %v304_v48 = vrot.slane %v303_v39, 4  ;;  %v2103_v49 = vrot.slane %v2101_v42, 4  ;;  %v2114_v51 = vshrl.u32 %v6420_v33, 16  ;;  %v182_v42 = vld [vmem:[%s6315_s25 + $0x3c] sm:$0xf] }
  0x33   : > { %v2106_v50 = vrot.slane %v2104_v43, 5  ;;  %v2099_v53 = vsel %vm6341_vm4, %v2094_v44, %v2098_v21  ;;  %v313_v55 = vor.u32 %v312_v45, %v308_v35  ;;  %v2112_v56 = vrot.slane %v2110_v26, 5  ;;  %v183_v26 = vld [vmem:[%s6315_s25 + $0x40] sm:$0xf] }
  0x34   : > { %v2120_v57 = vshll.u32 %v6428_v40, 16  ;;  %v5098_v59 = vcombine.low %v2089_v38, %v2099_v53  ;;  %v309_v61 = vsel %vm6341_vm4, %v304_v48, %v308_v35  ;;  %v2116_v2 = vrot.slane %v2114_v51, 4 }
  0x35   : > { %v2107_v0 = vor.u32 %v2106_v50, %v2103_v49  ;;  %v314_v5 = vrot.slane %v313_v55, 4  ;;  %v321_v7 = vshrl.u32 %v180_v52, 16  ;;  %v324_v8 = vshll.u32 %v180_v52, 16 }
  0x36   : > { %v2122_v6 = vrot.slane %v2120_v57, 5  ;;  %5702 = vmatprep.mubr.msk.bf16.mxu0 %vm658_vm3, %v5098_v59  ;;  %v2117_v17 = vor.u32 %v2116_v2, %v2112_v56  ;;  %v330_v10 = vshll.u32 %v181_v58, 16  ;;  %v334_v11 = vshrl.u32 %v181_v58, 16  ;;  %v5062_v2 = vld [vmem:[%s6315_s25 + $0x48] sm:$0xf] }
  0x37   : > { %v2108_v9 = vrot.slane %v2107_v0, 4  ;;  %v319_v13 = vsel %vm6341_vm4, %v314_v5, %v318_v47  ;;  %v323_v14 = vrot.slane %v321_v7, 4  ;;  %v326_v18 = vrot.slane %v324_v8, 5  ;;  %v6468_v8 = vld [vmem:[%s6315_s25 + $0x4c] sm:$0xf] }
  0x38   : > { %v340_v19 = vshll.u32 %v209_v4, 16  ;;  %v4872_v21 = vcombine.low %v309_v61, %v319_v13  ;;  %v2118_v24 = vrot.slane %v2117_v17, 4  ;;  %v332_v25 = vrot.slane %v330_v10, 5  ;;  %v210_v61 = vld [vmem:[%s6315_s25 + $0x44] sm:$0x1] }
  0x39   : > { %v2113_v23 = vsel %vm6341_vm4, %v2108_v9, %v2112_v56  ;;  %v327_v27 = vor.u32 %v326_v18, %v323_v14  ;;  %v336_v29 = vrot.slane %v334_v11, 4  ;;  %v2125_v35 = vshrl.u32 %v5059_v12, 16 }
  0x3a   : > { %v342_v31 = vrot.slane %v340_v19, 5  ;;  %5567 = vmatmul.mubr.msk.bf16.gmra.mrb[4].mxu1 %vm658_vm3, %v4872_v21  ;;  %v2123_v37 = vsel %vm6341_vm4, %v2118_v24, %v2122_v6  ;;  %v2128_v36 = vshll.u32 %v5059_v12, 16  ;;  %v2134_v38 = vshll.u32 %v6445_v20, 16 }
  0x3b   : > { %v2138_v39 = vshrl.u32 %v6445_v20, 16  ;;  %v5099_v43 = vcombine.low %v2113_v23, %v2123_v37  ;;  %v328_v44 = vrot.slane %v327_v27, 4  ;;  %v337_v45 = vor.u32 %v336_v29, %v332_v25  ;;  %v6476_v23 = vld [vmem:[%s6315_s25 + $0x50] sm:$0x1]  ;;  %v6480_v27 = vld [vmem:[%s6315_s25 + $0x48] sm:$0xf] }
  0x3c   : > { %v2127_v47 = vrot.slane %v2125_v35, 4  ;;  %v2130_v48 = vrot.slane %v2128_v36, 5  ;;  %v2136_v49 = vrot.slane %v2134_v38, 5  ;;  %v2144_v51 = vshll.u32 %v6450_v34, 16  ;;  %v6483_v36 = vld [vmem:[%s6315_s25 + $0x4c] sm:$0xf] }
  0x3d   : > { %v2140_v50 = vrot.slane %v2138_v39, 4  ;;  %5703 = vmatmul.mubr.msk.bf16.gmra.mrb[4].mxu0 %vm658_vm3, %v5099_v43  ;;  %v333_v52 = vsel %vm6341_vm4, %v328_v44, %v332_v25  ;;  %v338_v53 = vrot.slane %v337_v45, 4  ;;  %v345_v55 = vshrl.u32 %v182_v42, 16 }
  0x3e   : > { %v348_v56 = vshll.u32 %v182_v42, 16  ;;  %v2131_v57 = vor.u32 %v2130_v48, %v2127_v47  ;;  %v2146_v59 = vrot.slane %v2144_v51, 5  ;;  %v354_v0 = vshll.u32 %v183_v26, 16 }
  0x3f   : > { %v2141_v58 = vor.u32 %v2140_v50, %v2136_v49  ;;  %v343_v4 = vsel %vm6341_vm4, %v338_v53, %v342_v31  ;;  %v347_v5 = vrot.slane %v345_v55, 4  ;;  %v358_v7 = vshrl.u32 %v183_v26, 16  ;;  %v211_v26 = vld [vmem:[%s6315_s25 + $0x50] sm:$0x1]  ;;  %v5065_v53 = vld [vmem:[%s6315_s25 + $0x54] sm:$0xf] }
  0x40   : > { %v350_v6 = vrot.slane %v348_v56, 5  ;;  %v4873_v9 = vcombine.low %v333_v52, %v343_v4  ;;  %v2132_v17 = vrot.slane %v2131_v57, 4  ;;  %v356_v11 = vrot.slane %v354_v0, 5  ;;  %v6499_v4 = vld [vmem:[%s6315_s25 + $0x58] sm:$0xf] }
  0x41   : > { %v2142_v10 = vrot.slane %v2141_v58, 4  ;;  %v360_v13 = vrot.slane %v358_v7, 4  ;;  %v364_v14 = vshll.u32 %v210_v61, 16  ;;  %v2149_v18 = vshrl.u32 %v5062_v2, 16 }
  0x42   : > { %v351_v12 = vor.u32 %v350_v6, %v347_v5  ;;  %5570 = vmatprep.mubr.msk.bf16.mxu1 %vm658_vm3, %v4873_v9  ;;  %v2137_v19 = vsel %vm6341_vm4, %v2132_v17, %v2136_v49  ;;  %v2152_v24 = vshll.u32 %v5062_v2, 16  ;;  %v2158_v25 = vshll.u32 %v6468_v8, 16 }
  0x43   : > { %v2147_v21 = vsel %vm6341_vm4, %v2142_v10, %v2146_v59  ;;  %v361_v35 = vor.u32 %v360_v13, %v356_v11  ;;  %v366_v37 = vrot.slane %v364_v14, 5  ;;  %v2151_v38 = vrot.slane %v2149_v18, 4 }
  0x44   : > { %v5100_v29 = vcombine.low %v2137_v19, %v2147_v21  ;;  %v352_v31 = vrot.slane %v351_v12, 4  ;;  %v2154_v39 = vrot.slane %v2152_v24, 5  ;;  %v2160_v42 = vrot.slane %v2158_v25, 5  ;;  %v6505_v12 = vld [vmem:[%s6315_s25 + $0x5c] sm:$0x1] }
  0x45   : > { %v2162_v43 = vshrl.u32 %v6468_v8, 16  ;;  %v362_v45 = vrot.slane %v361_v35, 4  ;;  %v2168_v47 = vshll.u32 %v6476_v23, 16  ;;  %v369_v48 = vshrl.u32 %v6480_v27, 16  ;;  %v6509_v24 = vld [vmem:[%s6315_s25 + $0x54] sm:$0xf] }
  0x46   : > { %5706 = vmatprep.mubr.msk.bf16.mxu0 %vm658_vm3, %v5100_v29  ;;  %v357_v44 = vsel %vm6341_vm4, %v352_v31, %v356_v11  ;;  %v2155_v49 = vor.u32 %v2154_v39, %v2151_v38  ;;  %v372_v51 = vshll.u32 %v6480_v27, 16  ;;  %v378_v52 = vshll.u32 %v6483_v36, 16 }
  0x47   : > { %v2164_v50 = vrot.slane %v2162_v43, 4  ;;  %v367_v55 = vsel %vm6341_vm4, %v362_v45, %v366_v37  ;;  %v2170_v56 = vrot.slane %v2168_v47, 5  ;;  %v371_v57 = vrot.slane %v369_v48, 4  ;;  %v6515_v37 = vld [vmem:[%s6315_s25 + $0x58] sm:$0xf] }
  0x48   : > { %v382_v58 = vshrl.u32 %v6483_v36, 16  ;;  %v4874_v59 = vcombine.low %v357_v44, %v367_v55  ;;  %v2156_v61 = vrot.slane %v2155_v49, 4  ;;  %v374_v2 = vrot.slane %v372_v51, 5 }
  0x49   : > { %v2165_v0 = vor.u32 %v2164_v50, %v2160_v42  ;;  %v380_v5 = vrot.slane %v378_v52, 5  ;;  %v388_v7 = vshll.u32 %v211_v26, 16  ;;  %v2173_v9 = vshrl.u32 %v5065_v53, 16  ;;  %v212_v26 = vld [vmem:[%s6315_s25 + $0x5c] sm:$0x1] }
  0x4a   : > { %v384_v6 = vrot.slane %v382_v58, 4  ;;  %5571 = vmatmul.mubr.msk.bf16.gmra.mrb[8].mxu1 %vm658_vm3, %v4874_v59  ;;  %v2161_v17 = vsel %vm6341_vm4, %v2156_v61, %v2160_v42  ;;  %v375_v11 = vor.u32 %v374_v2, %v371_v57  ;;  %v2176_v13 = vshll.u32 %v5065_v53, 16  ;;  %v5068_v53 = vld [vmem:[%s6315_s25 + $0x60] sm:$0xf]  ;;  %v6529_v59 = vld [vmem:[%s6315_s25 + $0x64] sm:$0xf] }
  0x4b   : > { %v2166_v10 = vrot.slane %v2165_v0, 4  ;;  %v390_v18 = vrot.slane %v388_v7, 5  ;;  %v2175_v19 = vrot.slane %v2173_v9, 4  ;;  %v2182_v21 = vshll.u32 %v6499_v4, 16  ;;  %v6536_v9 = vld [vmem:[%s6315_s25 + $0x68] sm:$0x1] }
  0x4c   : > { %v385_v14 = vor.u32 %v384_v6, %v380_v5  ;;  %v376_v29 = vrot.slane %v375_v11, 4  ;;  %v2178_v31 = vrot.slane %v2176_v13, 5  ;;  %v2186_v35 = vshrl.u32 %v6499_v4, 16 }
  0x4d   : > { %v2171_v25 = vsel %vm6341_vm4, %v2166_v10, %v2170_v56  ;;  %v2184_v42 = vrot.slane %v2182_v21, 5  ;;  %v2192_v43 = vshll.u32 %v6505_v12, 16  ;;  %v393_v48 = vshrl.u32 %v6509_v24, 16 }
  0x4e   : > { %v5101_v38 = vcombine.low %v2161_v17, %v2171_v25  ;;  %v386_v39 = vrot.slane %v385_v14, 4  ;;  %v381_v44 = vsel %vm6341_vm4, %v376_v29, %v380_v5  ;;  %v2179_v45 = vor.u32 %v2178_v31, %v2175_v19  ;;  %v6540_v19 = vld [vmem:[%s6315_s25 + $0x60] sm:$0xf] }
  0x4f   : > { %v2188_v47 = vrot.slane %v2186_v35, 4  ;;  %v2194_v50 = vrot.slane %v2192_v43, 5  ;;  %v396_v51 = vshll.u32 %v6509_v24, 16  ;;  %v402_v52 = vshll.u32 %v6515_v37, 16  ;;  %v6546_v35 = vld [vmem:[%s6315_s25 + $0x64] sm:$0xf] }
  0x50   : > { %5707 = vmatmul.mubr.msk.bf16.gmra.mrb[8].mxu0 %vm658_vm3, %v5101_v38  ;;  %v391_v49 = vsel %vm6341_vm4, %v386_v39, %v390_v18  ;;  %v2180_v56 = vrot.slane %v2179_v45, 4  ;;  %v395_v58 = vrot.slane %v393_v48, 4  ;;  %v406_v2 = vshrl.u32 %v6515_v37, 16 }
  0x51   : > { %v4875_v55 = vcombine.low %v381_v44, %v391_v49  ;;  %v2189_v57 = vor.u32 %v2188_v47, %v2184_v42  ;;  %v398_v61 = vrot.slane %v396_v51, 5  ;;  %v404_v0 = vrot.slane %v402_v52, 5 }
  0x52   : > { %v412_v5 = vshll.u32 %v212_v26, 16  ;;  %v2185_v6 = vsel %vm6341_vm4, %v2180_v56, %v2184_v42  ;;  %v2197_v17 = vshrl.u32 %v5068_v53, 16  ;;  %v2200_v10 = vshll.u32 %v5068_v53, 16 }
  0x53   : > { %5574 = vmatprep.mubr.msk.bf16.mxu1 %vm658_vm3, %v4875_v55  ;;  %v2190_v7 = vrot.slane %v2189_v57, 4  ;;  %v399_v11 = vor.u32 %v398_v61, %v395_v58  ;;  %v408_v13 = vrot.slane %v406_v2, 4  ;;  %v2206_v18 = vshll.u32 %v6529_v59, 16  ;;  %v5128_v58 = vld [vmem:[%s6315_s25 + $0xc] sm:$0xe] }
  0x54   : > { %v414_v14 = vrot.slane %v412_v5, 5  ;;  %v2199_v25 = vrot.slane %v2197_v17, 4  ;;  %v2202_v29 = vrot.slane %v2200_v10, 5  ;;  %v2210_v31 = vshrl.u32 %v6529_v59, 16 }
  0x55   : > { %v2195_v21 = vsel %vm6341_vm4, %v2190_v7, %v2194_v50  ;;  %v400_v39 = vrot.slane %v399_v11, 4  ;;  %v409_v42 = vor.u32 %v408_v13, %v404_v0  ;;  %v2208_v43 = vrot.slane %v2206_v18, 5  ;;  %v213_v50 = vld [vmem:[%s6315_s25 + $0x68] sm:$0x1] }
  0x56   : > { %v5102_v38 = vcombine.low %v2185_v6, %v2195_v21  ;;  %v2203_v44 = vor.u32 %v2202_v29, %v2199_v25  ;;  %v2212_v45 = vrot.slane %v2210_v31, 4  ;;  %v2216_v47 = vshll.u32 %v6536_v9, 16  ;;  %v6574_v29 = vld [vmem:[%s6315_s25 + $0x70] sm:$0xf] }
  0x57   : > { %v417_v26 = vshrl.u32 %v6540_v19, 16  ;;  %v405_v48 = vsel %vm6341_vm4, %v400_v39, %v404_v0  ;;  %v410_v49 = vrot.slane %v409_v42, 4  ;;  %v420_v51 = vshll.u32 %v6540_v19, 16  ;;  %v6561_v0 = vld [vmem:[%s6315_s25 + $0x6c] sm:$0xf] }
  0x58   : > { %5710 = vmatprep.mubr.msk.bf16.mxu0 %vm658_vm3, %v5102_v38  ;;  %v426_v52 = vshll.u32 %v6546_v35, 16  ;;  %v2204_v53 = vrot.slane %v2203_v44, 4  ;;  %v2213_v55 = vor.u32 %v2212_v45, %v2208_v43  ;;  %v2218_v56 = vrot.slane %v2216_v47, 5 }
  0x59   : > { %v419_v57 = vrot.slane %v417_v26, 4  ;;  %v415_v61 = vsel %vm6341_vm4, %v410_v49, %v414_v14  ;;  %v422_v2 = vrot.slane %v420_v51, 5  ;;  %v430_v6 = vshrl.u32 %v6546_v35, 16  ;;  %v214_v26 = vld [vmem:[%s6315_s25 + $0x74] sm:$0x1] }
  0x5a   : > { %v428_v5 = vrot.slane %v426_v52, 5  ;;  %v4876_v7 = vcombine.low %v405_v48, %v415_v61  ;;  %v2209_v17 = vsel %vm6341_vm4, %v2204_v53, %v2208_v43  ;;  %v2214_v10 = vrot.slane %v2213_v55, 4  ;;  %v5129_v48 = vld [vmem:[%s6315_s25 + $0x18] sm:$0xe] }
  0x5b   : > { %v436_v11 = vshll.u32 %v213_v50, 16  ;;  %v423_v14 = vor.u32 %v422_v2, %v419_v57  ;;  %v432_v18 = vrot.slane %v430_v6, 4  ;;  %v5144_v21 = vrot.slane %v5128_v58, 9  ;;  %v6593_v53 = vld [vmem:[%s6315_s25 + $0x78] sm:$0xf] }
  0x5c   : > { %v2774_v25 = vrot.slane %v2772_v62, 4  ;;  %5575 = vmatmul.mubr.msk.bf16.gmra.mrb[12].mxu1 %vm658_vm3, %v4876_v7  ;;  %v2219_v31 = vsel %vm6341_vm4, %v2214_v10, %v2218_v56  ;;  %v441_v39 = vshrl.u32 %v6561_v0, 16  ;;  %v444_v42 = vshll.u32 %v6561_v0, 16  ;;  %v215_v57 = vld [vmem:[%s6315_s25 + $0x80] sm:$0x1] }
  0x5d   : > { %v438_v38 = vrot.slane %v436_v11, 5  ;;  %v5103_v43 = vcombine.low %v2209_v17, %v2219_v31  ;;  %v424_v44 = vrot.slane %v423_v14, 4  ;;  %v433_v45 = vor.u32 %v432_v18, %v428_v5  ;;  %v5130_v10 = vld [vmem:[%s6315_s25 + $0x24] sm:$0xe] }
  0x5e   : > { %v2773_v47 = vsel %vm6567_vm7, %v5144_v21, %v2772_v62  ;;  %v2776_v49 = vsel %vm6567_vm7, %v2774_v25, %v2775_v63  ;;  %v443_v50 = vrot.slane %v441_v39, 4  ;;  %v446_v51 = vrot.slane %v444_v42, 5  ;;  %v6619_v39 = vld [vmem:[%s6315_s25 + $0x84] sm:$0xf] }
  0x5f   : > { %v450_v52 = vshll.u32 %v6574_v29, 16  ;;  %5711 = vmatmul.mubr.msk.bf16.gmra.mrb[12].mxu0 %vm658_vm3, %v5103_v43  ;;  %v429_v15 = vsel %vm6341_vm4, %v424_v44, %v428_v5  ;;  %v434_v62 = vrot.slane %v433_v45, 4  ;;  %v5161_v55 = vcombine.low %v2773_v47, %v2776_v49  ;;  %v6627_v43 = vld [vmem:[%s6315_s25 + $0x88] sm:$0xf] }
  0x60   : > { %v454_v56 = vshrl.u32 %v6574_v29, 16  ;;  %v447_v63 = vor.u32 %v446_v51, %v443_v50  ;;  %v460_v61 = vshll.u32 %v214_v26, 16  ;;  %v5145_v2 = vrot.slane %v5129_v48, 9 }
  0x61   : > { %v452_v58 = vrot.slane %v450_v52, 5  ;;  %v439_v6 = vsel %vm6341_vm4, %v434_v62, %v438_v38  ;;  %5732 = vmatprep.mubr.msk.bf16.mxu0 %vm658_vm3, %v5161_v55  ;;  %v2783_v5 = vsel %vm6567_vm7, %v6384_v30, %v2782_v28  ;;  %v465_v17 = vshrl.u32 %v6593_v53, 16  ;;  %v216_v52 = vld [vmem:[%s6315_s25 + $0x8c] sm:$0x1] }
  0x62   : > { %v456_v7 = vrot.slane %v454_v56, 4  ;;  %v4877_v11 = vcombine.low %v429_v15, %v439_v6  ;;  %v448_v14 = vrot.slane %v447_v63, 4  ;;  %v462_v18 = vrot.slane %v460_v61, 5 }
  0x63   : > { %v2780_v21 = vsel %vm6567_vm7, %v5145_v2, %v2779_v22  ;;  %v467_v38 = vrot.slane %v465_v17, 4  ;;  %v468_v1 = vshll.u32 %v6593_v53, 16  ;;  %v474_v30 = vshll.u32 %v6600_v16, 16  ;;  %v6632_v22 = vld [vmem:[%s8010_s1 + $0xe] sm:$0x3] }
  0x64   : > { %v457_v25 = vor.u32 %v456_v7, %v452_v58  ;;  %v5162_v31 = vcombine.low %v2780_v21, %v2783_v5  ;;  %5578 = vmatprep.mubr.msk.bf16.mxu1 %vm658_vm3, %v4877_v11  ;;  %v453_v28 = vsel %vm6341_vm4, %v448_v14, %v452_v58  ;;  %v478_v60 = vshrl.u32 %v6600_v16, 16  ;;  %v6651_v5 = vld [vmem:[%s6315_s25 + $0x90] sm:$0xf] }
  0x65   : > { %v484_v42 = vshll.u32 %v215_v57, 16  ;;  %v470_v45 = vrot.slane %v468_v1, 5  ;;  %v5146_v47 = vrot.slane %v5130_v10, 9  ;;  %v2786_v26 = vrot.slane %v6391_v46, 5  ;;  %v5131_v57 = vld [vmem:[%s6315_s25 + $0x30] sm:$0xe] }
  0x66   : > { %v458_v44 = vrot.slane %v457_v25, 4  ;;  %v476_v48 = vrot.slane %v474_v30, 5  ;;  %v480_v49 = vrot.slane %v478_v60, 4  ;;  %v2789_v51 = vrot.slane %v6400_v54, 5  ;;  %v6663_v30 = vld [vmem:[%s6315_s25 + $0x94] sm:$0xf] }
  0x67   : > { %v486_v50 = vrot.slane %v484_v42, 5  ;;  %5733 = vmatmul.mubr.msk.bf16.vlgmr.msra.gmra.mrb[0].mxu0 %vm658_vm3, %v5162_v31  ;;  %v471_v62 = vor.u32 %v470_v45, %v467_v38  ;;  %v2787_v55 = vsel %vm6567_vm7, %v5146_v47, %v2786_v26  ;;  %v2788_v56 = vrot.slane %v2786_v26, 4  ;;  %v217_v60 = vld [vmem:[%s6315_s25 + $0x98] sm:$0x1]  ;;  %v5132_v26 = vld [vmem:[%s6315_s25 + $0x3c] sm:$0xe] }
  0x68   : > { %v463_v15 = vsel %vm6341_vm4, %v458_v44, %v462_v18  ;;  %5765 = vmatpush3.bf16.msra.mxu0 %v6351_v41  ;;  %v481_v46 = vor.u32 %v480_v49, %v476_v48  ;;  %v489_v58 = vshrl.u32 %v6619_v39, 16  ;;  %v492_v54 = vshll.u32 %v6619_v39, 16 }
  0x69   : > { %v4878_v63 = vcombine.low %v453_v28, %v463_v15  ;;  %v472_v61 = vrot.slane %v471_v62, 4  ;;  %v2790_v2 = vsel %vm6567_vm7, %v2788_v56, %v2789_v51  ;;  %v498_v6 = vshll.u32 %v6627_v43, 16  ;;  %6132 = vmatprep.subr.msk.bf16.mxu0 %vm707_vm0, %v6632_v22 }
  0x6a   : > { %v502_v7 = vshrl.u32 %v6627_v43, 16  ;;  %v482_v41 = vrot.slane %v481_v46, 4  ;;  %v5163_v17 = vcombine.low %v2787_v55, %v2790_v2  ;;  %v491_v10 = vrot.slane %v489_v58, 4  ;;  %v6683_v46 = vld [vmem:[%s6315_s25 + $0xa0] sm:$0xf] }
  0x6b   : > { %5579 = vmatmul.mubr.msk.bf16.gmra.mrb[16].mxu1 %vm658_vm3, %v4878_v63  ;;  %v494_v11 = vrot.slane %v492_v54, 5  ;;  %v477_v14 = vsel %vm6341_vm4, %v472_v61, %v476_v48  ;;  %v500_v18 = vrot.slane %v498_v6, 5  ;;  %v508_v25 = vshll.u32 %v216_v52, 16  ;;  %v6672_v52 = vld [vmem:[%s6315_s25 + $0x9c] sm:$0xf] }
  0x6c   : > { %v504_v21 = vrot.slane %v502_v7, 4  ;;  %v487_v31 = vsel %vm6341_vm4, %v482_v41, %v486_v50  ;;  %5736 = vmatprep.mubr.msk.bf16.mxu0 %vm658_vm3, %v5163_v17  ;;  %v5147_v1 = vrot.slane %v5131_v57, 9  ;;  %v2793_v28 = vrot.slane %v6420_v33, 5 }
  0x6d   : > { %v495_v38 = vor.u32 %v494_v11, %v491_v10  ;;  %v4879_v42 = vcombine.low %v477_v14, %v487_v31  ;;  %v510_v45 = vrot.slane %v508_v25, 5  ;;  %v2796_v47 = vrot.slane %v6428_v40, 5  ;;  %v218_v10 = vld [vmem:[%s6315_s25 + $0xa4] sm:$0x1]  ;;  %v5133_v11 = vld [vmem:[%s6315_s25 + $0x48] sm:$0xe] }
  0x6e   : > { %v505_v44 = vor.u32 %v504_v21, %v500_v18  ;;  %v2794_v49 = vsel %vm6567_vm7, %v5147_v1, %v2793_v28  ;;  %v2795_v50 = vrot.slane %v2793_v28, 4  ;;  %v513_v51 = vshrl.u32 %v6651_v5, 16 }
  0x6f   : > { %v496_v48 = vrot.slane %v495_v38, 4  ;;  %5582 = vmatprep.mubr.msk.bf16.mxu1 %vm658_vm3, %v4879_v42  ;;  %v516_v15 = vshll.u32 %v6651_v5, 16  ;;  %v522_v62 = vshll.u32 %v6663_v30, 16  ;;  %v526_v40 = vshrl.u32 %v6663_v30, 16 }
  0x70   : > { %v506_v33 = vrot.slane %v505_v44, 4  ;;  %v2797_v56 = vsel %vm6567_vm7, %v2795_v50, %v2796_v47  ;;  %v515_v57 = vrot.slane %v513_v51, 4  ;;  %v532_v63 = vshll.u32 %v217_v60, 16 }
  0x71   : > { %v501_v55 = vsel %vm6341_vm4, %v496_v48, %v500_v18  ;;  %v5164_v54 = vcombine.low %v2794_v49, %v2797_v56  ;;  %v518_v61 = vrot.slane %v516_v15, 5  ;;  %v524_v2 = vrot.slane %v522_v62, 5  ;;  %v6709_v56 = vld [vmem:[%s6315_s25 + $0xac] sm:$0xf] }
  0x72   : > { %v511_v58 = vsel %vm6341_vm4, %v506_v33, %v510_v45  ;;  %v528_v7 = vrot.slane %v526_v40, 4  ;;  %v534_v41 = vrot.slane %v532_v63, 5  ;;  %v5148_v17 = vrot.slane %v5132_v26, 9  ;;  %v6704_v33 = vld [vmem:[%s6315_s25 + $0xa8] sm:$0xf] }
  0x73   : > { %v4880_v6 = vcombine.low %v501_v55, %v511_v58  ;;  %5737 = vmatmul.mubr.msk.bf16.gmra.mrb[4].mxu0 %vm658_vm3, %v5164_v54  ;;  %v519_v14 = vor.u32 %v518_v61, %v515_v57  ;;  %v2800_v18 = vrot.slane %v6445_v20, 5  ;;  %v2803_v21 = vrot.slane %v6450_v34, 5  ;;  %v219_v61 = vld [vmem:[%s6315_s25 + $0xb0] sm:$0x1] }
  0x74   : > { %v537_v25 = vshrl.u32 %v6672_v52, 16  ;;  %v529_v31 = vor.u32 %v528_v7, %v524_v2  ;;  %v540_v38 = vshll.u32 %v6672_v52, 16  ;;  %v546_v1 = vshll.u32 %v6683_v46, 16 }
  0x75   : > { %5583 = vmatmul.mubr.msk.bf16.gmra.mrb[20].mxu1 %vm658_vm3, %v4880_v6  ;;  %v550_v28 = vshrl.u32 %v6683_v46, 16  ;;  %v520_v60 = vrot.slane %v519_v14, 4  ;;  %v2801_v42 = vsel %vm6567_vm7, %v5148_v17, %v2800_v18  ;;  %v2802_v20 = vrot.slane %v2800_v18, 4  ;;  %v6724_v14 = vld [vmem:[%s6315_s25 + $0xb4] sm:$0xf] }
  0x76   : > { %v539_v44 = vrot.slane %v537_v25, 4  ;;  %v530_v34 = vrot.slane %v529_v31, 4  ;;  %v542_v45 = vrot.slane %v540_v38, 5  ;;  %v548_v47 = vrot.slane %v546_v1, 5 }
  0x77   : > { %v552_v26 = vrot.slane %v550_v28, 4  ;;  %v525_v48 = vsel %vm6341_vm4, %v520_v60, %v524_v2  ;;  %v2804_v49 = vsel %vm6567_vm7, %v2802_v20, %v2803_v21  ;;  %v556_v50 = vshll.u32 %v218_v10, 16  ;;  %v5134_v2 = vld [vmem:[%s6315_s25 + $0x54] sm:$0xe] }
  0x78   : > { %v5149_v51 = vrot.slane %v5133_v11, 9  ;;  %v535_v15 = vsel %vm6341_vm4, %v530_v34, %v534_v41  ;;  %v5165_v62 = vcombine.low %v2801_v42, %v2804_v49  ;;  %v543_v40 = vor.u32 %v542_v45, %v539_v44  ;;  %v6733_v42 = vld [vmem:[%s6315_s25 + $0xb8] sm:$0xf]  ;;  %v220_v49 = vld [vmem:[%s6315_s25 + $0xbc] sm:$0x1] }
  0x79   : > { %v553_v55 = vor.u32 %v552_v26, %v548_v47  ;;  %v4881_v57 = vcombine.low %v525_v48, %v535_v15  ;;  %v558_v63 = vrot.slane %v556_v50, 5  ;;  %v2807_v58 = vrot.slane %v6468_v8, 5 }
  0x7a   : > { %v2810_v54 = vrot.slane %v6476_v23, 5  ;;  %5740 = vmatprep.mubr.msk.bf16.mxu0 %vm658_vm3, %v5165_v62  ;;  %v544_v6 = vrot.slane %v543_v40, 4  ;;  %v561_v41 = vshrl.u32 %v6704_v33, 16  ;;  %v564_v17 = vshll.u32 %v6704_v33, 16 }
  0x7b   : > { %v554_v7 = vrot.slane %v553_v55, 4  ;;  %5586 = vmatprep.mubr.msk.bf16.mxu1 %vm658_vm3, %v4881_v57  ;;  %v2808_v10 = vsel %vm6567_vm7, %v5149_v51, %v2807_v58  ;;  %v2809_v11 = vrot.slane %v2807_v58, 4  ;;  %v570_v8 = vshll.u32 %v6709_v56, 16  ;;  %v5135_v55 = vld [vmem:[%s6315_s25 + $0x60] sm:$0xe] }
  0x7c   : > { %v574_v23 = vshrl.u32 %v6709_v56, 16  ;;  %v549_v18 = vsel %vm6341_vm4, %v544_v6, %v548_v47  ;;  %v563_v25 = vrot.slane %v561_v41, 4  ;;  %v566_v31 = vrot.slane %v564_v17, 5  ;;  %v5136_v6 = vld [vmem:[%s6315_s25 + $0x6c] sm:$0xe] }
  0x7d   : > { %v559_v21 = vsel %vm6341_vm4, %v554_v7, %v558_v63  ;;  %v2811_v1 = vsel %vm6567_vm7, %v2809_v11, %v2810_v54  ;;  %v572_v28 = vrot.slane %v570_v8, 5  ;;  %v580_v34 = vshll.u32 %v219_v61, 16  ;;  %v5072_v11 = vld [vmem:[%s6315_s25 + $0x70] sm:$0xf]  ;;  %v5073_v8 = vld [vmem:[%s6315_s25 + $0x74] sm:$0x1] }
  0x7e   : > { %v4882_v38 = vcombine.low %v549_v18, %v559_v21  ;;  %v576_v60 = vrot.slane %v574_v23, 4  ;;  %v5166_v20 = vcombine.low %v2808_v10, %v2811_v1  ;;  %v567_v44 = vor.u32 %v566_v31, %v563_v25 }
  0x7f   : > { %v5150_v45 = vrot.slane %v5134_v2, 9  ;;  %v2814_v26 = vrot.slane %v6499_v4, 5  ;;  %v2817_v48 = vrot.slane %v6505_v12, 5  ;;  %v585_v50 = vshrl.u32 %v6724_v14, 16 }
  0x80   : > { %5587 = vmatmul.mubr.msk.bf16.gmra.mrb[24].mxu1 %vm658_vm3, %v4882_v38  ;;  %v577_v47 = vor.u32 %v576_v60, %v572_v28  ;;  %5741 = vmatmul.mubr.msk.bf16.gmra.mrb[8].mxu0 %vm658_vm3, %v5166_v20  ;;  %v568_v51 = vrot.slane %v567_v44, 4  ;;  %v582_v15 = vrot.slane %v580_v34, 5  ;;  %v588_v62 = vshll.u32 %v6724_v14, 16 }
  0x81   : > { %v594_v40 = vshll.u32 %v6733_v42, 16  ;;  %v2815_v4 = vsel %vm6567_vm7, %v5150_v45, %v2814_v26  ;;  %v2816_v12 = vrot.slane %v2814_v26, 4  ;;  %v587_v63 = vrot.slane %v585_v50, 4 }
  0x82   : > { %v578_v57 = vrot.slane %v577_v47, 4  ;;  %v573_v58 = vsel %vm6341_vm4, %v568_v51, %v572_v28  ;;  %v590_v54 = vrot.slane %v588_v62, 5  ;;  %v598_v2 = vshrl.u32 %v6733_v42, 16  ;;  %v5137_v47 = vld [vmem:[%s6315_s25 + $0x78] sm:$0xe] }
  0x83   : > { %v596_v61 = vrot.slane %v594_v40, 5  ;;  %v2818_v41 = vsel %vm6567_vm7, %v2816_v12, %v2817_v48  ;;  %v604_v17 = vshll.u32 %v220_v49, 16  ;;  %v5151_v10 = vrot.slane %v5135_v55, 9  ;;  %v6194_v51 = vld [vmem:[%s6315_s25] sm:$0xf] }
  0x84   : > { %v583_v7 = vsel %vm6341_vm4, %v578_v57, %v582_v15  ;;  %v5167_v18 = vcombine.low %v2815_v4, %v2818_v41  ;;  %v591_v21 = vor.u32 %v590_v54, %v587_v63  ;;  %v600_v25 = vrot.slane %v598_v2, 4  ;;  %v6771_v15 = vld [vmem:[%s6315_s25 + $0x4] sm:$0xf]  ;;  %v6775_v40 = vld [vmem:[%s6315_s25 + $0x7c] sm:$0xf] }
  0x85   : > { %v4883_v23 = vcombine.low %v573_v58, %v583_v7  ;;  %v606_v31 = vrot.slane %v604_v17, 5  ;;  %v2821_v38 = vrot.slane %v6529_v59, 5  ;;  %v2824_v1 = vrot.slane %v6536_v9, 5  ;;  %v6778_v55 = vld [vmem:[%s6315_s25 + $0x80] sm:$0x1] }
  0x86   : > { %v5152_v28 = vrot.slane %v5136_v6, 9  ;;  %5744 = vmatprep.mubr.msk.bf16.mxu0 %vm658_vm3, %v5167_v18  ;;  %v592_v60 = vrot.slane %v591_v21, 4  ;;  %v601_v20 = vor.u32 %v600_v25, %v596_v61  ;;  %v2828_v44 = vrot.slane %v5072_v11, 5  ;;  %v5078_v57 = vld [vmem:[%s6315_s25 + $0x88] sm:$0xf] }
  0x87   : > { %5590 = vmatprep.mubr.msk.bf16.mxu1 %vm658_vm3, %v4883_v23  ;;  %v2831_v34 = vrot.slane %v5073_v8, 5  ;;  %v2822_v45 = vsel %vm6567_vm7, %v5151_v10, %v2821_v38  ;;  %v2823_v59 = vrot.slane %v2821_v38, 4  ;;  %v4901_v62 = vcombine.low %v6194_v51, %v6771_v15  ;;  %v5079_v54 = vld [vmem:[%s6315_s25 + $0x8c] sm:$0x1]  ;;  %v5081_v17 = vld [vmem:[%s6315_s25 + $0x94] sm:$0xf] }
  0x88   : > { %v597_v9 = vsel %vm6341_vm4, %v592_v60, %v596_v61  ;;  %v602_v26 = vrot.slane %v601_v20, 4  ;;  %v2829_v48 = vsel %vm6567_vm7, %v5152_v28, %v2828_v44  ;;  %v2830_v49 = vrot.slane %v2828_v44, 4  ;;  %v5138_v61 = vld [vmem:[%s6315_s25 + $0x84] sm:$0xe]  ;;  %v5139_v23 = vld [vmem:[%s6315_s25 + $0x90] sm:$0xe] }
  0x89   : > { %v2825_v50 = vsel %vm6567_vm7, %v2823_v59, %v2824_v1  ;;  %v5153_v58 = vrot.slane %v5137_v47, 9  ;;  %v2835_v7 = vrot.slane %v6775_v40, 5  ;;  %v2838_v41 = vrot.slane %v6778_v55, 5  ;;  %v5082_v25 = vld [vmem:[%s6315_s25 + $0x98] sm:$0x1] }
  0x8a   : > { %v607_v4 = vsel %vm6341_vm4, %v602_v26, %v606_v31  ;;  %v5168_v12 = vcombine.low %v2822_v45, %v2825_v50  ;;  %v2832_v63 = vsel %vm6567_vm7, %v2830_v49, %v2831_v34  ;;  %v5154_v10 = vrot.slane %v5138_v61, 9  ;;  %v5084_v31 = vld [vmem:[%s6315_s25 + $0xa0] sm:$0xf]  ;;  %v5085_v60 = vld [vmem:[%s6315_s25 + $0xa4] sm:$0x1] }
  0x8b   : > { %v4884_v2 = vcombine.low %v597_v9, %v607_v4  ;;  %v5169_v6 = vcombine.low %v2829_v48, %v2832_v63  ;;  %v2842_v11 = vrot.slane %v5078_v57, 5  ;;  %v2845_v8 = vrot.slane %v5079_v54, 5  ;;  %v5140_v20 = vld [vmem:[%s6315_s25 + $0x9c] sm:$0xe]  ;;  %v6196_v44 = vld [vmem:[%s6315_s25 + $0xc] sm:$0xf] }
  0x8c   : > { %5745 = vmatmul.mubr.msk.bf16.gmra.mrb[12].mxu0 %vm658_vm3, %v5168_v12  ;;  %v2836_v18 = vsel %vm6567_vm7, %v5153_v58, %v2835_v7  ;;  %v2837_v21 = vrot.slane %v2835_v7, 4  ;;  %v2849_v28 = vrot.slane %v5081_v17, 5  ;;  %v6805_v34 = vld [vmem:[%s6315_s25 + $0x10] sm:$0xf]  ;;  %v6198_v47 = vld [vmem:[%s6315_s25 + $0x18] sm:$0xf] }
  0x8d   : > { %5591 = vmatmul.mubr.msk.bf16.gmra.mrb[28].mxu1 %vm658_vm3, %v4884_v2  ;;  %5748 = vmatprep.mubr.msk.bf16.mxu0 %vm658_vm3, %v5169_v6  ;;  %v2843_v38 = vsel %vm6567_vm7, %v5154_v10, %v2842_v11  ;;  %v2844_v1 = vrot.slane %v2842_v11, 4  ;;  %v4902_v45 = vcombine.low %v6196_v44, %v6805_v34  ;;  %v6812_v9 = vld [vmem:[%s6315_s25 + $0x1c] sm:$0xf]  ;;  %v5155_v48 = vrot.slane %v5139_v23, 9  ;;  %v5087_v57 = vld [vmem:[%s6315_s25 + $0xac] sm:$0xf] }
  0x8e   : > { %5596 = vmatprep.mubr.msk.bf16.mxu1 %vm658_vm3, %v4901_v62  ;;  %v2839_v59 = vsel %vm6567_vm7, %v2837_v21, %v2838_v41  ;;  %v4903_v26 = vcombine.low %v6198_v47, %v6812_v9  ;;  %v2851_v51 = vrot.slane %v2849_v28, 4  ;;  %v2852_v62 = vrot.slane %v5082_v25, 5  ;;  %v6200_v54 = vld [vmem:[%s8010_s1 + $0x4] sm:$0x3]  ;;  %v5090_v2 = vld [vmem:[%s6315_s25 + $0xb8] sm:$0xf] }
  0x8f   : > { %v5170_v49 = vcombine.low %v2836_v18, %v2839_v59  ;;  %v2846_v50 = vsel %vm6567_vm7, %v2844_v1, %v2845_v8  ;;  %v5156_v12 = vrot.slane %v5140_v20, 9  ;;  %v2856_v63 = vrot.slane %v5084_v31, 5  ;;  %v6827_v7 = vld [vmem:[%s8010_s1 + $0x6] sm:$0x3]  ;;  %v5088_v10 = vld [vmem:[%s6315_s25 + $0xb0] sm:$0x1] }
  0x90   : > { %v5171_v4 = vcombine.low %v2843_v38, %v2846_v50  ;;  %v2859_v58 = vrot.slane %v5085_v60, 5  ;;  %v1426_v61 = vsel %vm707_vm0, %v6200_v54, 0  ;;  %v2850_v41 = vsel %vm6567_vm7, %v5155_v48, %v2849_v28  ;;  %v5141_v11 = vld [vmem:[%s6315_s25 + $0xa8] sm:$0xe]  ;;  %v5091_v25 = vld [vmem:[%s6315_s25 + $0xbc] sm:$0x1] }
  0x91   : > { %v2858_v6 = vrot.slane %v2856_v63, 4  ;;  %v2853_v17 = vsel %vm6567_vm7, %v2851_v51, %v2852_v62  ;;  %v2863_v8 = vrot.slane %v5087_v57, 5  ;;  %v2857_v23 = vsel %vm6567_vm7, %v5156_v12, %v2856_v63  ;;  %v5142_v31 = vld [vmem:[%s6315_s25 + $0xb4] sm:$0xe]  ;;  %v6201_v38 = vld [vmem:[%s6315_s25 + $0x24] sm:$0xf] }
  0x92   : > { %v2870_v21 = vrot.slane %v5090_v2, 5  ;;  %v6848_v1 = vld [vmem:[%s6315_s25 + $0x28] sm:$0xf]  ;;  %v5172_v60 = vcombine.low %v2850_v41, %v2853_v17  ;;  %v5157_v44 = vrot.slane %v5141_v11, 9  ;;  %v2866_v59 = vrot.slane %v5088_v10, 5 }
  0x93   : > { %v2860_v18 = vsel %vm6567_vm7, %v2858_v6, %v2859_v58  ;;  %v4904_v28 = vcombine.low %v6201_v38, %v6848_v1  ;;  %v6203_v47 = vld [vmem:[%s6315_s25 + $0x30] sm:$0xf]  ;;  %v2873_v51 = vrot.slane %v5091_v25, 5  ;;  %v5093_v62 = vld [vmem:[%s6315_s25 + $0xc4] sm:$0xf]  ;;  %v2258_v25 = vshrl.u32 %v6775_v40, 16 }
  0x94   : > { %5749 = vmatmul.mubr.msk.bf16.gmra.mrb[16].mxu0 %vm658_vm3, %v5170_v49  ;;  %v5173_v20 = vcombine.low %v2857_v23, %v2860_v18  ;;  %v5158_v49 = vrot.slane %v5142_v31, 9  ;;  %v2872_v50 = vrot.slane %v2870_v21, 4  ;;  %v2864_v57 = vsel %vm6567_vm7, %v5157_v44, %v2863_v8  ;;  %v5143_v12 = vld [vmem:[%s6315_s25 + $0xc0] sm:$0xe]  ;;  %v6205_v41 = vld [vmem:[%s6315_s25 + $0x3c] sm:$0xf] }
  0x95   : > { %5597 = vmatmul.mubr.msk.bf16.vlgmr.msra.gmra.mrb[0].mxu1 %vm658_vm3, %v4902_v45  ;;  %5752 = vmatprep.mubr.msk.bf16.mxu0 %vm658_vm3, %v5171_v4  ;;  %v2865_v45 = vrot.slane %v2863_v8, 4  ;;  %v2877_v63 = vrot.slane %v5093_v62, 5  ;;  %v5159_v6 = vrot.slane %v5143_v12, 9  ;;  %v6873_v17 = vld [vmem:[%s6315_s25 + $0x40] sm:$0xf]  ;;  %v4907_v18 = vcombine.low %v6480_v27, %v6483_v36  ;;  %v6157_v62 = vld [vmem:[%s6315_s25 + $0x24] sm:$0xff]  }
  0x96   : > { %5629 = vmatpush3.bf16.msra.mxu1 %v1426_v61  ;;  %5600 = vmatprep.mubr.msk.bf16.mxu1 %vm658_vm3, %v4903_v26  ;;  %v6853_v26 = vld [vmem:[%s6315_s25 + $0x34] sm:$0xf]  ;;  %v2871_v58 = vsel %vm6567_vm7, %v5158_v49, %v2870_v21  ;;  %v2874_v54 = vsel %vm6567_vm7, %v2872_v50, %v2873_v51  ;;  %v5094_v61 = vld [vmem:[%s6315_s25 + $0xc8] sm:$0x1]  ;;  %v4906_v10 = vcombine.low %v6205_v41, %v6873_v17  ;;  %v2254_v21 = vshll.u32 %v6775_v40, 16 }
  0x97   : > { %6127 = vmatprep.subr.msk.bf16.mxu1 %vm707_vm0, %v6827_v7  ;;  %v4905_v48 = vcombine.low %v6203_v47, %v6853_v26  ;;  %v2867_v4 = vsel %vm6567_vm7, %v2865_v45, %v2866_v59  ;;  %v5175_v11 = vcombine.low %v2871_v58, %v2874_v54  ;;  %v2879_v8 = vrot.slane %v2877_v63, 4  ;;  %v1164_v45 = vld [vmem:[%s6315_s25] sm:$0xe]  ;;  %v1165_v59 = vld [vmem:[%s6315_s25 + $0xc] sm:$0xe] }
  0x98   : > { %v5174_v2 = vcombine.low %v2864_v57, %v2867_v4  ;;  %v2880_v23 = vrot.slane %v5094_v61, 5  ;;  %v2878_v31 = vsel %vm6567_vm7, %v5159_v6, %v2877_v63  ;;  %v6888_v27 = vrot.slane %v2254_v21, 5  ;;  %v1168_v41 = vld [vmem:[%s6315_s25 + $0x30] sm:$0xe] }
  0x99   : > { %v2260_v36 = vrot.slane %v2258_v25, 4  ;;  %v4909_v44 = vcombine.low %v6540_v19, %v6546_v35  ;;  %v2264_v47 = vshll.u32 %v6778_v55, 16  ;;  %v4933_v19 = vrot.slane %v1164_v45, 9 }
  0x9a   : > { %v2881_v38 = vsel %vm6567_vm7, %v2879_v8, %v2880_v23  ;;  %8031 = vst [vmem:[#allocation3_spill] sm:$0xff] %v6888_v27  ;;  %v4934_v35 = vrot.slane %v1165_v59, 9  ;;  %v1231_v4 = vrot.slane %v6812_v9, 5  ;;  %v1238_v12 = vrot.slane %v6848_v1, 5  ;;  %v1169_v8 = vld [vmem:[%s6315_s25 + $0x3c] sm:$0xe] }
  0x9b   : > { %v5176_v40 = vcombine.low %v2878_v31, %v2881_v38  ;;  %v2261_v49 = vor.u32 %v2260_v36, %v6888_v27  ;;  %v6908_v51 = vrot.slane %v2264_v47, 5  ;;  %v4910_v58 = vcombine.low %v6561_v0, %v6574_v29  ;;  %v1170_v31 = vld [vmem:[%s6315_s25 + $0x48] sm:$0xe]  ;;  %v6211_v59 = vld [vmem:[%s6315_s25 + $0x38] sm:$0x1] }
  0x9c   : > { %5753 = vmatmul.mubr.msk.bf16.gmra.mrb[20].mxu0 %vm658_vm3, %v5172_v60  ;;  %v4908_v60 = vcombine.low %v6509_v24, %v6515_v37  ;;  %v6208_v24 = vld [vmem:[%s6315_s25 + $0x14] sm:$0x1]  ;;  %v4066_v54 = vsel %vm707_vm0, %v6632_v22, 0  ;;  %v4911_v61 = vcombine.low %v6593_v53, %v6600_v16  ;;  %v4912_v6 = vcombine.low %v6619_v39, %v6627_v43  ;;  %v6209_v16 = vld [vmem:[%s6315_s25 + $0x20] sm:$0x1] }
  0x9d   : > { %5601 = vmatmul.mubr.msk.bf16.gmra.mrb[4].mxu1 %vm658_vm3, %v4904_v28  ;;  %5756 = vmatprep.mubr.msk.bf16.mxu0 %vm658_vm3, %v5173_v20  ;;  %v1224_v28 = vrot.slane %v6805_v34, 5  ;;  %v6155_v20 = vld [vmem:[%s6315_s25 + $0x18] sm:$0xff]   ;;  %v6207_v34 = vld [vmem:[%s6315_s25 + $0x8] sm:$0x1]  ;;  %v1227_v37 = vrot.slane %v6208_v24, 5  ;;  %8032 = vst [vmem:[#allocation4_spill] sm:$0xff] %v6908_v51  ;;  %v4913_v9 = vcombine.low %v6651_v5, %v6663_v30 }
  0x9e   : > { %5604 = vmatprep.mubr.msk.bf16.mxu1 %vm658_vm3, %v4905_v48  ;;  %v1217_v48 = vrot.slane %v6771_v15, 5  ;;  %v1220_v50 = vrot.slane %v6207_v34, 5  ;;  %v1166_v15 = vld [vmem:[%s6315_s25 + $0x18] sm:$0xe]  ;;  %v6913_v63 = vrot.slane %v2261_v49, 4  ;;  %v1234_v22 = vrot.slane %v6209_v16, 5 }
  0x9f   : > { %v1226_v55 = vrot.slane %v1224_v28, 4  ;;  %v4935_v1 = vrot.slane %v1166_v15, 9  ;;  %v6935_v29 = vsel %vm6567_vm7, %v4934_v35, %v1224_v28  ;;  %v1240_v25 = vrot.slane %v1238_v12, 4  ;;  %v5258_v24 = vld [vmem:[%s6315_s25 + $0x18] sm:$0xf] }
  0xa0   : > { %v1219_v57 = vrot.slane %v1217_v48, 4  ;;  %8033 = vst [vmem:[#allocation5_spill] sm:$0xff] %v6913_v63  ;;  %v6931_v0 = vsel %vm6567_vm7, %v4933_v19, %v1217_v48  ;;  %v1248_v47 = vrot.slane %v6211_v59, 5  ;;  %v6972_v49 = vsel %vm707_vm0, %v6827_v7, 0  ;;  %v5259_v7 = vld [vmem:[%s6315_s25 + $0x1c] sm:$0xf] }
  0xa1   : > { %v6939_v53 = vsel %vm6567_vm7, %v1226_v55, %v1227_v37  ;;  %v6976_v34 = vsel %vm6567_vm7, %v4935_v1, %v1231_v4  ;;  %v6161_v37 = vld [vmem:[%s6315_s25 + $0x3c] sm:$0xff]   ;;  %v4938_v35 = vrot.slane %v1169_v8, 9  ;;  %v6212_v55 = vld [vmem:[%s6315_s25 + $0x44] sm:$0x1]  ;;  %v3587_v8 = vshll.u32 %v5258_v24, 16 }
  0xa2   : > { %v6950_v23 = vsel %vm6567_vm7, %v1219_v57, %v1220_v50  ;;  %v1171_v50 = vld [vmem:[%s6315_s25 + $0x54] sm:$0xe]  ;;  %v1255_v15 = vrot.slane %v6212_v55, 5  ;;  %v5262_v39 = vld [vmem:[%s6315_s25 + $0x28] sm:$0xf] }
  0xa3   : > { %v6219_v5 = vld [vmem:[%s6315_s25 + $0x70] sm:$0xf] }
  0xa4   : > { %5757 = vmatmul.mubr.msk.bf16.gmra.mrb[24].mxu0 %vm658_vm3, %v5174_v2  ;;  %v1167_v2 = vld [vmem:[%s6315_s25 + $0x24] sm:$0xe]  ;;  %v1280_v30 = vrot.slane %v6219_v5, 5 }
  0xa5   : > { %5605 = vmatmul.mubr.msk.bf16.gmra.mrb[8].mxu1 %vm658_vm3, %v4906_v10  ;;  %5760 = vmatprep.mubr.msk.bf16.mxu0 %vm658_vm3, %v5175_v11  ;;  %v1245_v10 = vrot.slane %v6853_v26, 5  ;;  %v6159_v11 = vld [vmem:[%s6315_s25 + $0x30] sm:$0xff]   ;;  %v4936_v21 = vrot.slane %v1167_v2, 9 }
  0xa6   : > { %5608 = vmatprep.mubr.msk.bf16.mxu1 %vm658_vm3, %v4907_v18  ;;  %v6946_v26 = vld [vmem:[%s8010_s1 + $0x10] sm:$0x3]  ;;  %v1233_v18 = vrot.slane %v1231_v4, 4  ;;  %v1282_v48 = vrot.slane %v1280_v30, 4 }
  0xa7   : > { %v1247_v45 = vrot.slane %v1245_v10, 4  ;;  %v6983_v19 = vsel %vm6567_vm7, %v4936_v21, %v1238_v12  ;;  %v3597_v21 = vshrl.u32 %v5259_v7, 16 }
  0xa8   : > { %v6992_v4 = vsel %vm6567_vm7, %v1233_v18, %v1234_v22  ;;  %v3584_v22 = vshrl.u32 %v5258_v24, 16  ;;  %v3593_v18 = vshll.u32 %v5259_v7, 16  ;;  %v5261_v24 = vld [vmem:[%s6315_s25 + $0x24] sm:$0xf] }
  0xa9   : > { %v7005_v1 = vsel %vm6567_vm7, %v1247_v45, %v1248_v47 }
  0xaa   : > { %v3586_v43 = vrot.slane %v3584_v22, 4  ;;  %v7047_v7 = vrot.slane %v3593_v18, 5  ;;  %v3611_v22 = vshll.u32 %v5261_v24, 16  ;;  %v3621_v18 = vshrl.u32 %v5262_v39, 16 }
  0xac   : > { %5761 = vmatmul.mubr.msk.bf16.gmra.mrb[28].mxu0 %vm658_vm3, %v5176_v40  ;;  %v6210_v40 = vld [vmem:[%s6315_s25 + $0x2c] sm:$0x1]  ;;  %v3613_v27 = vrot.slane %v3611_v22, 5 }
  0xad   : > { %5609 = vmatmul.mubr.msk.bf16.gmra.mrb[12].mxu1 %vm658_vm3, %v4908_v60  ;;  %5766 = vmatprep.mubr.msk.bf16.mxu0 %vm658_vm3, %v6155_v20  ;;  %v1241_v28 = vrot.slane %v6210_v40, 5  ;;  %v1252_v60 = vrot.slane %v6873_v17, 5  ;;  %v6215_v40 = vld [vmem:[%s6315_s25 + $0x50] sm:$0x1]  ;;  %v6220_v17 = vld [vmem:[%s6315_s25 + $0x74] sm:$0x1] }
  0xae   : > { %5612 = vmatprep.mubr.msk.bf16.mxu1 %vm658_vm3, %v4909_v44  ;;  %v4937_v44 = vrot.slane %v1168_v41, 9  ;;  %v4940_v41 = vrot.slane %v1171_v50, 9  ;;  %v1172_v50 = vld [vmem:[%s6315_s25 + $0x60] sm:$0xe]  ;;  %v5263_v20 = vld [vmem:[%s6315_s25 + $0x2c] sm:$0x1] }
  0xaf   : > { %v1254_v12 = vrot.slane %v1252_v60, 4  ;;  %v7018_v45 = vsel %vm6567_vm7, %v4938_v35, %v1252_v60  ;;  %v6216_v35 = vld [vmem:[%s6315_s25 + $0x5c] sm:$0x1] }
  0xb0   : > { %v7001_v2 = vsel %vm6567_vm7, %v4937_v44, %v1245_v10  ;;  %v1269_v55 = vrot.slane %v6216_v35, 5  ;;  %v1173_v35 = vld [vmem:[%s6315_s25 + $0x6c] sm:$0xe] }
  0xb1   : > { %v7022_v59 = vsel %vm6567_vm7, %v1254_v12, %v1255_v15  ;;  %v6217_v15 = vld [vmem:[%s6315_s25 + $0x64] sm:$0xf]  ;;  %v3599_v12 = vrot.slane %v3597_v21, 4  ;;  %v4942_v5 = vrot.slane %v1173_v35, 9 }
  0xb2   : > { %v6167_v21 = vld [vmem:[%s6315_s25 + $0x60] sm:$0xff]  }
  0xb4   : > { %5767 = vmatmul.mubr.msk.bf16.vlgmr.msra.gmra.mrb[0].mxu0 %vm658_vm3, %v6157_v62  ;;  %v6213_v62 = vld [vmem:[%s6315_s25 + $0x4c] sm:$0xf] }
  0xb5   : > { %5613 = vmatmul.mubr.msk.bf16.gmra.mrb[16].mxu1 %vm658_vm3, %v4910_v58  ;;  %5799 = vmatpush3.bf16.msra.mxu0 %v4066_v54  ;;  %v1259_v57 = vrot.slane %v6213_v62, 5  ;;  %v6996_v58 = vsel %vm6567_vm7, %v1240_v25, %v1241_v28  ;;  %v4939_v54 = vrot.slane %v1170_v31, 9  ;;  %v1262_v28 = vrot.slane %v6215_v40, 5 }
  0xb6   : > { %5616 = vmatprep.mubr.msk.bf16.mxu1 %vm658_vm3, %v4911_v61  ;;  %5770 = vmatprep.mubr.msk.bf16.mxu0 %vm658_vm3, %v6159_v11  ;;  %v6163_v61 = vld [vmem:[%s6315_s25 + $0x48] sm:$0xff]   ;;  %v6214_v11 = vld [vmem:[%s6315_s25 + $0x58] sm:$0xf]  ;;  %v1273_v62 = vrot.slane %v6217_v15, 5  ;;  %v5265_v15 = vld [vmem:[%s6315_s25 + $0x34] sm:$0xf] }
  0xb7   : > { %6133 = vmatprep.subr.msk.bf16.mxu0 %vm707_vm0, %v6946_v26  ;;  %v1266_v16 = vrot.slane %v6214_v11, 5  ;;  %v1261_v31 = vrot.slane %v1259_v57, 4  ;;  %v7026_v47 = vsel %vm6567_vm7, %v4939_v54, %v1259_v57  ;;  %v5260_v57 = vld [vmem:[%s6315_s25 + $0x20] sm:$0x1]  ;;  %v5264_v54 = vld [vmem:[%s6315_s25 + $0x30] sm:$0xf] }
  0xb8   : > { %v4941_v11 = vrot.slane %v1172_v50, 9  ;;  %v3635_v50 = vshll.u32 %v5264_v54, 16  ;;  %v3603_v25 = vshll.u32 %v5260_v57, 16  ;;  %v3641_v36 = vshll.u32 %v5265_v15, 16 }
  0xb9   : > { %v7037_v60 = vsel %vm6567_vm7, %v4940_v41, %v1266_v16  ;;  %v7053_v41 = vsel %vm6567_vm7, %v1261_v31, %v1262_v28  ;;  %v1275_v31 = vrot.slane %v1273_v62, 4  ;;  %v3632_v28 = vshrl.u32 %v5264_v54, 16 }
  0xba   : > { %v7095_v35 = vrot.slane %v3641_v36, 5 }
  0xbc   : > { %5771 = vmatmul.mubr.msk.bf16.gmra.mrb[4].mxu0 %vm658_vm3, %v6161_v37  ;;  %v1268_v37 = vrot.slane %v1266_v16, 4  ;;  %v6218_v16 = vld [vmem:[%s6315_s25 + $0x68] sm:$0x1] }
  0xbd   : > { %5617 = vmatmul.mubr.msk.bf16.gmra.mrb[20].mxu1 %vm658_vm3, %v4912_v6  ;;  %5774 = vmatprep.mubr.msk.bf16.mxu0 %vm658_vm3, %v6163_v61  ;;  %v3589_v6 = vrot.slane %v3587_v8, 5  ;;  %v6165_v61 = vld [vmem:[%s6315_s25 + $0x54] sm:$0xff]   ;;  %v1276_v40 = vrot.slane %v6218_v16, 5  ;;  %v3617_v8 = vshll.u32 %v5262_v39, 16  ;;  %v3600_v16 = vor.u32 %v3599_v12, %v7047_v7 }
  0xbe   : > { %5620 = vmatprep.mubr.msk.bf16.mxu1 %vm658_vm3, %v4913_v9  ;;  %v3608_v9 = vshrl.u32 %v5261_v24, 16  ;;  %v7062_v44 = vsel %vm6567_vm7, %v1268_v37, %v1269_v55  ;;  %v1283_v24 = vrot.slane %v6220_v17, 5  ;;  %v3645_v39 = vshrl.u32 %v5265_v15, 16 }
  0xbf   : > { %v3590_v10 = vor.u32 %v3589_v6, %v3586_v43  ;;  %v7068_v37 = vrot.slane %v3617_v8, 5  ;;  %v3623_v55 = vrot.slane %v3621_v18, 4  ;;  %v8034_v43 = vcombine.low %v6672_v52, %v6683_v46  ;;  %v6221_v8 = vld [vmem:[%s6315_s25 + $0x7c] sm:$0xf]  ;;  %v7104_v18 = vld [vmem:[%s6315_s25 + $0x38] sm:$0x1] }
  0xc0   : > { %v3610_v38 = vrot.slane %v3608_v9, 4  ;;  %v7077_v17 = vsel %vm6567_vm7, %v4941_v11, %v1273_v62  ;;  %v7081_v57 = vsel %vm6567_vm7, %v1275_v31, %v1276_v40  ;;  %v3634_v6 = vrot.slane %v3632_v28, 4  ;;  %8036 = vst [vmem:[#allocation6_spill] sm:$0xff] %v7104_v18 }
  0xc1   : > { %v3637_v12 = vrot.slane %v3635_v50, 5  ;;  %v8035_v52 = vcombine.low %v6704_v33, %v6709_v56  ;;  %v3591_v46 = vrot.slane %v3590_v10, 4  ;;  %v3601_v54 = vrot.slane %v3600_v16, 4  ;;  %v6169_v33 = vld [vmem:[%s6315_s25 + $0x6c] sm:$0xff]   ;;  %v1175_v16 = vld [vmem:[%s6315_s25 + $0x84] sm:$0xe] }
  0xc2   : > { %v3627_v62 = vshll.u32 %v5263_v20, 16  ;;  %v7089_v11 = vsel %vm6567_vm7, %v4942_v5, %v1280_v30  ;;  %v7093_v40 = vsel %vm6567_vm7, %v1282_v48, %v1283_v24  ;;  %v3647_v9 = vrot.slane %v3645_v39, 4  ;;  %v6170_v48 = vld [vmem:[%s6315_s25 + $0x78] sm:$0xff]  }
  0xc3   : > { %v3614_v10 = vor.u32 %v3613_v27, %v3610_v38  ;;  %v3624_v20 = vor.u32 %v3623_v55, %v7068_v37  ;;  %v1287_v30 = vrot.slane %v6221_v8, 5  ;;  %v3638_v38 = vor.u32 %v3637_v12, %v3634_v6  ;;  %v5267_v5 = vld [vmem:[%s6315_s25 + $0x3c] sm:$0xf] }
  0xc4   : > { %5775 = vmatmul.mubr.msk.bf16.gmra.mrb[8].mxu0 %vm658_vm3, %v6165_v61  ;;  %v3605_v61 = vrot.slane %v3603_v25, 5  ;;  %v1174_v25 = vld [vmem:[%s6315_s25 + $0x78] sm:$0xe]  ;;  %v7120_v50 = vrot.slane %v3627_v62, 5  ;;  %v3648_v39 = vor.u32 %v3647_v9, %v7095_v35  ;;  %v3651_v55 = vshll.u32 %v7104_v18, 16 }
  0xc5   : > { %5621 = vmatmul.mubr.msk.bf16.gmra.mrb[24].mxu1 %vm658_vm3, %v8034_v43  ;;  %5778 = vmatprep.mubr.msk.bf16.mxu0 %vm658_vm3, %v6167_v21  ;;  %v3596_v21 = vsel %vm6341_vm4, %v3591_v46, %v7047_v7  ;;  %v4943_v24 = vrot.slane %v1174_v25, 9  ;;  %v6222_v43 = vld [vmem:[%s6315_s25 + $0x88] sm:$0xf]  ;;  %v7128_v7 = vld [vmem:[%s6315_s25 + $0x40] sm:$0xf]  ;;  %v3615_v12 = vrot.slane %v3614_v10, 4  ;;  %v8038_v62 = vcombine.low %v6724_v14, %v6733_v42 }
  0xc6   : > { %5624 = vmatprep.mubr.msk.bf16.mxu1 %vm658_vm3, %v8035_v52  ;;  %v3606_v31 = vsel %vm6341_vm4, %v3601_v54, %v3605_v61  ;;  %v1294_v6 = vrot.slane %v6222_v43, 5  ;;  %8037 = vst [vmem:[#allocation7_spill] sm:$0xff] %v7128_v7  ;;  %v3625_v52 = vrot.slane %v3624_v20, 4  ;;  %v1289_v46 = vrot.slane %v1287_v30, 4  ;;  %v6223_v54 = vld [vmem:[%s6315_s25 + $0x80] sm:$0x1] }
  0xc7   : > { %v1290_v61 = vrot.slane %v6223_v54, 5  ;;  %v3639_v9 = vrot.slane %v3638_v38, 4  ;;  %v4944_v25 = vrot.slane %v1175_v16, 9  ;;  %v3656_v8 = vshrl.u32 %v5267_v5, 16  ;;  %v6171_v10 = vld [vmem:[%s6315_s25 + $0x84] sm:$0xff]  }
  0xc8   : > { %v3659_v43 = vshll.u32 %v5267_v5, 16  ;;  %v7142_v20 = vcombine.low %v3596_v21, %v3606_v31  ;;  %v7146_v14 = vsel %vm707_vm0, %v6946_v26, 0  ;;  %v3669_v38 = vshrl.u32 %v7128_v7, 16  ;;  %v6172_v21 = vld [vmem:[%s6315_s25 + $0x90] sm:$0xff]   ;;  %v6228_v18 = vld [vmem:[%s6315_s25 + $0xa0] sm:$0xf] }
  0xc9   : > { %v3649_v16 = vrot.slane %v3648_v39, 4  ;;  %v3653_v5 = vrot.slane %v3651_v55, 5  ;;  %v1296_v54 = vrot.slane %v1294_v6, 4  ;;  %v3620_v31 = vsel %vm6341_vm4, %v3615_v12, %v7068_v37 }
  0xca   : > { %v3630_v26 = vsel %vm6341_vm4, %v3625_v52, %v7120_v50  ;;  %v7161_v39 = vsel %vm6567_vm7, %v4943_v24, %v1287_v30  ;;  %v7165_v55 = vsel %vm6567_vm7, %v1289_v46, %v1290_v61  ;;  %v3644_v37 = vsel %vm6341_vm4, %v3639_v9, %v7095_v35  ;;  %v5273_v30 = vld [vmem:[%s6315_s25 + $0x54] sm:$0xf]  ;;  %v7182_v24 = vld [vmem:[%s6315_s25 + $0x58] sm:$0xf]  ;;  %v7187_v61 = vld [vmem:[%s6315_s25 + $0x90] sm:$0xe] }
  0xcb   : > { %v7178_v12 = vsel %vm6567_vm7, %v4944_v25, %v1294_v6  ;;  %v3658_v50 = vrot.slane %v3656_v8, 4  ;;  %v3661_v52 = vrot.slane %v3659_v43, 5  ;;  %v3671_v46 = vrot.slane %v3669_v38, 4 }
  0xcc   : > { %5779 = vmatmul.mubr.msk.bf16.gmra.mrb[12].mxu0 %vm658_vm3, %v6169_v33  ;;  %v8039_v33 = vcombine.low %v6931_v0, %v6950_v23  ;;  %v6224_v0 = vld [vmem:[%s6315_s25 + $0x8c] sm:$0x1]  ;;  %v3654_v36 = vsel %vm6341_vm4, %v3649_v16, %v3653_v5  ;;  %v3704_v25 = vshrl.u32 %v5273_v30, 16  ;;  %v3707_v8 = vshll.u32 %v5273_v30, 16 }
  0xcd   : > { %5625 = vmatmul.mubr.msk.bf16.gmra.mrb[28].mxu1 %vm658_vm3, %v8038_v62  ;;  %5782 = vmatprep.mubr.msk.bf16.mxu0 %vm658_vm3, %v6170_v48  ;;  %v3665_v48 = vshll.u32 %v7128_v7, 16  ;;  %v1297_v23 = vrot.slane %v6224_v0, 5  ;;  %v5270_v62 = vld [vmem:[%s6315_s25 + $0x48] sm:$0xf]  ;;  %v7171_v0 = vld [vmem:[%s6315_s25 + $0x4c] sm:$0xf]  ;;  %v8041_v38 = vcombine.low %v6935_v29, %v6939_v53  ;;  %v7205_v16 = vcombine.low %v3620_v31, %v3630_v26 }
  0xce   : > { %5630 = vmatprep.mubr.msk.bf16.mxu1 %vm658_vm3, %v8039_v33  ;;  %v7168_v33 = vld [vmem:[%s6315_s25 + $0x44] sm:$0x1]  ;;  %v3680_v27 = vshrl.u32 %v5270_v62, 16  ;;  %v3683_v15 = vshll.u32 %v5270_v62, 16  ;;  %v3689_v6 = vshll.u32 %v7171_v0, 16  ;;  %v3693_v9 = vshrl.u32 %v7171_v0, 16 }
  0xcf   : > { %8040 = vst [vmem:[#allocation8_spill] sm:$0xff] %v7168_v33  ;;  %v7184_v28 = vrot.slane %v3665_v48, 5  ;;  %v7193_v35 = vsel %vm6567_vm7, %v1296_v54, %v1297_v23  ;;  %v3713_v43 = vshll.u32 %v7182_v24, 16  ;;  %v3717_v48 = vshrl.u32 %v7182_v24, 16  ;;  %v5276_v31 = vld [vmem:[%s6315_s25 + $0x60] sm:$0xf] }
  0xd0   : > { %v3675_v5 = vshll.u32 %v7168_v33, 16  ;;  %v4945_v54 = vrot.slane %v7187_v61, 9  ;;  %v8042_v23 = vcombine.low %v6976_v34, %v6992_v4  ;;  %v7216_v29 = vcombine.low %v3644_v37, %v3654_v36  ;;  %v6173_v26 = vld [vmem:[%s6315_s25 + $0x9c] sm:$0xff]   ;;  %v6174_v30 = vld [vmem:[%s6315_s25 + $0xa8] sm:$0xff]  }
  0xd1   : > { %v3662_v53 = vor.u32 %v3661_v52, %v3658_v50  ;;  %v3682_v62 = vrot.slane %v3680_v27, 4  ;;  %v7227_v34 = vrot.slane %v3689_v6, 5  ;;  %v3695_v4 = vrot.slane %v3693_v9, 4  ;;  %v6225_v36 = vld [vmem:[%s8010_s1 + $0x8] sm:$0x3] }
  0xd2   : > { %v3706_v27 = vrot.slane %v3704_v25, 4  ;;  %v3709_v37 = vrot.slane %v3707_v8, 5  ;;  %v7236_v50 = vrot.slane %v3713_v43, 5  ;;  %v3719_v52 = vrot.slane %v3717_v48, 4  ;;  %v6226_v6 = vld [vmem:[%s6315_s25 + $0x94] sm:$0xf] }
  0xd3   : > { %v7242_v9 = vld [vmem:[%s6315_s25 + $0x64] sm:$0xf]  ;;  %v3728_v61 = vshrl.u32 %v5276_v31, 16  ;;  %v7244_v22 = vrot.slane %v3662_v53, 4  ;;  %v1308_v25 = vrot.slane %v6228_v18, 5  ;;  %v3696_v43 = vor.u32 %v3695_v4, %v7227_v34 }
  0xd4   : > { %5783 = vmatmul.mubr.msk.bf16.gmra.mrb[16].mxu0 %vm658_vm3, %v6171_v10  ;;  %8043 = vst [vmem:[#allocation9_spill] sm:$0xff] %v7242_v9  ;;  %v3731_v10 = vshll.u32 %v5276_v31, 16  ;;  %v3710_v31 = vor.u32 %v3709_v37, %v3706_v27  ;;  %v3720_v53 = vor.u32 %v3719_v52, %v7236_v50  ;;  %v8044_v18 = vcombine.low %v6983_v19, %v6996_v58  ;;  %v6175_v37 = vld [vmem:[%s6315_s25 + $0xb4] sm:$0xff]  }
  0xd5   : > { %5631 = vmatmul.mubr.msk.bf16.vlgmr.msra.gmra.mrb[0].mxu1 %vm658_vm3, %v8041_v38  ;;  %5786 = vmatprep.mubr.msk.bf16.mxu0 %vm658_vm3, %v6172_v21  ;;  %v3685_v21 = vrot.slane %v3683_v15, 5  ;;  %v7225_v38 = vld [vmem:[%s6315_s25 + $0x50] sm:$0x1]  ;;  %v7234_v15 = vld [vmem:[%s6315_s25 + $0x5c] sm:$0x1]  ;;  %v8045_v27 = vcombine.low %v7001_v2, %v7005_v1  ;;  %v1310_v52 = vrot.slane %v1308_v25, 4 }
  0xd6   : > { %5663 = vmatpush3.bf16.msra.mxu1 %v6972_v49  ;;  %5634 = vmatprep.mubr.msk.bf16.mxu1 %vm658_vm3, %v8042_v23  ;;  %v3672_v49 = vor.u32 %v3671_v46, %v7184_v28  ;;  %v7238_v46 = vrot.slane %v3675_v5, 5  ;;  %v1301_v23 = vrot.slane %v6226_v6, 5  ;;  %v3699_v48 = vshll.u32 %v7225_v38, 16  ;;  %v1177_v5 = vld [vmem:[%s6315_s25 + $0x9c] sm:$0xe] }
  0xd7   : > { %6129 = vmatprep.subr.msk.bf16.mxu1 %vm707_vm0, %v6225_v36  ;;  %v6227_v36 = vld [vmem:[%s6315_s25 + $0x98] sm:$0x1]  ;;  %v3686_v7 = vor.u32 %v3685_v21, %v3682_v62  ;;  %v3723_v6 = vshll.u32 %v7234_v15, 16  ;;  %v3741_v62 = vshrl.u32 %v7242_v9, 16  ;;  %v3733_v4 = vrot.slane %v3731_v10, 5 }
  0xd8   : > { %v1304_v33 = vrot.slane %v6227_v36, 5  ;;  %v3673_v8 = vrot.slane %v3672_v49, 4  ;;  %v3737_v36 = vshll.u32 %v7242_v9, 16  ;;  %v7263_v21 = vsel %vm6567_vm7, %v4945_v54, %v1301_v23  ;;  %v7274_v2 = vld [vmem:[%s6315_s25 + $0x68] sm:$0x1] }
  0xd9   : > { %v3730_v49 = vrot.slane %v3728_v61, 4  ;;  %v3687_v19 = vrot.slane %v3686_v7, 4  ;;  %v4946_v58 = vrot.slane %v1177_v5, 9  ;;  %v3697_v3 = vrot.slane %v3696_v43, 4  ;;  %8046 = vst [vmem:[#allocation10_spill] sm:$0xff] %v7274_v2  ;;  %v6176_v5 = vld [vmem:[%s6315_s25 + $0xc0] sm:$0xff]  }
  0xda   : > { %v3701_v54 = vrot.slane %v3699_v48, 5  ;;  %v3725_v63 = vrot.slane %v3723_v6, 5  ;;  %v1315_v61 = vrot.slane %v6709_v56, 5  ;;  %v3711_v10 = vrot.slane %v3710_v31, 4  ;;  %v1179_v31 = vld [vmem:[%s6315_s25 + $0xb4] sm:$0xe] }
  0xdb   : > { %v3721_v51 = vrot.slane %v3720_v53, 4  ;;  %v7276_v1 = vrot.slane %v3737_v36, 5  ;;  %v3743_v7 = vrot.slane %v3741_v62, 4  ;;  %v3668_v43 = vsel %vm6341_vm4, %v7244_v22, %v7184_v28  ;;  %v6230_v62 = vld [vmem:[%s6315_s25 + $0xb0] sm:$0x1] }
  0xdc   : > { %5787 = vmatmul.mubr.msk.bf16.gmra.mrb[20].mxu0 %vm658_vm3, %v6173_v26  ;;  %v1303_v26 = vrot.slane %v1301_v23, 4  ;;  %v1178_v23 = vld [vmem:[%s6315_s25 + $0xa8] sm:$0xe]  ;;  %v3678_v48 = vsel %vm6341_vm4, %v3673_v8, %v7238_v46  ;;  %v3734_v6 = vor.u32 %v3733_v4, %v3730_v49  ;;  %v3692_v53 = vsel %vm6341_vm4, %v3687_v19, %v7227_v34  ;;  %v5279_v46 = vld [vmem:[%s6315_s25 + $0x6c] sm:$0xf] }
  0xdd   : > { %5635 = vmatmul.mubr.msk.bf16.gmra.mrb[4].mxu1 %vm658_vm3, %v8044_v18  ;;  %5790 = vmatprep.mubr.msk.bf16.mxu0 %vm658_vm3, %v6174_v30  ;;  %v6229_v18 = vld [vmem:[%s6315_s25 + $0xa4] sm:$0x1]  ;;  %v7296_v36 = vsel %vm6567_vm7, %v4946_v58, %v1308_v25  ;;  %v4947_v28 = vrot.slane %v1178_v23, 9  ;;  %v1317_v8 = vrot.slane %v1315_v61, 4  ;;  %v3747_v49 = vshll.u32 %v7274_v2, 16 }
  0xde   : > { %5638 = vmatprep.mubr.msk.bf16.mxu1 %vm658_vm3, %v8045_v27  ;;  %v1311_v30 = vrot.slane %v6229_v18, 5  ;;  %v7288_v56 = vsel %vm6567_vm7, %v1303_v26, %v1304_v33  ;;  %v3702_v33 = vsel %vm6341_vm4, %v3697_v3, %v3701_v54  ;;  %v1318_v26 = vrot.slane %v6230_v62, 5  ;;  %v5282_v18 = vld [vmem:[%s6315_s25 + $0x78] sm:$0xf]  ;;  %v7351_v54 = vld [vmem:[%s6315_s25 + $0xbc] sm:$0x1] }
  0xdf   : > { %v3716_v34 = vsel %vm6341_vm4, %v3711_v10, %v7236_v50  ;;  %v3726_v25 = vsel %vm6341_vm4, %v3721_v51, %v3725_v63  ;;  %v3744_v4 = vor.u32 %v3743_v7, %v7276_v1  ;;  %v4948_v27 = vrot.slane %v1179_v31, 9  ;;  %v7325_v51 = vld [vmem:[%s6315_s25 + $0x70] sm:$0xf]  ;;  %v7355_v10 = vld [vmem:[%s6315_s25 + $0x7c] sm:$0xf] }
  0xe0   : > { %v7300_v22 = vsel %vm6567_vm7, %v1310_v52, %v1311_v30  ;;  %v8048_v3 = vcombine.low %v7018_v45, %v7022_v59  ;;  %v7321_v19 = vrot.slane %v3734_v6, 4  ;;  %v1322_v50 = vrot.slane %v6733_v42, 5  ;;  %8049 = vst [vmem:[#allocation12_spill] sm:$0xff] %v7325_v51  ;;  %8051 = vst [vmem:[#allocation13_spill] sm:$0xff] %v7355_v10  ;;  %v5285_v7 = vld [vmem:[%s6315_s25 + $0x84] sm:$0xf] }
  0xe1   : > { %8047 = vst [vmem:[#allocation11_spill] sm:$0xff] %v7300_v22  ;;  %v3752_v63 = vshrl.u32 %v5279_v46, 16  ;;  %v8050_v45 = vcombine.low %v7026_v47, %v7053_v41  ;;  %v7333_v58 = vcombine.low %v3692_v53, %v3702_v33  ;;  %v7339_v42 = vsel %vm6567_vm7, %v4947_v28, %v1315_v61  ;;  %v6177_v61 = vld [vmem:[%s6315_s25 + $0xcc] sm:$0xff]   ;;  %v7367_v31 = vld [vmem:[%s6315_s25 + $0x88] sm:$0xf] }
  0xe2   : > { %v7342_v30 = vcombine.low %v3716_v34, %v3726_v25  ;;  %v7346_v47 = vsel %vm6567_vm7, %v1317_v8, %v1318_v26  ;;  %v7348_v41 = vrot.slane %v3747_v49, 5  ;;  %v3761_v6 = vshll.u32 %v7325_v51, 16  ;;  %8052 = vst [vmem:[#allocation14_spill] sm:$0xff] %v7367_v31  ;;  %v5288_v62 = vld [vmem:[%s6315_s25 + $0x90] sm:$0xf] }
  0xe3   : > { %v7373_v28 = vrot.slane %v1322_v50, 4  ;;  %v7375_v33 = vrot.slane %v3752_v63, 4  ;;  %v3765_v8 = vshrl.u32 %v7325_v51, 16  ;;  %v3776_v26 = vshrl.u32 %v5282_v18, 16  ;;  %v7382_v25 = vld [vmem:[%s6315_s25 + $0x94] sm:$0xf] }
  0xe4   : > { %5791 = vmatmul.mubr.msk.bf16.gmra.mrb[24].mxu0 %vm658_vm3, %v6175_v37  ;;  %v7319_v37 = vcombine.low %v3668_v43, %v3678_v48  ;;  %v7363_v43 = vsel %vm6567_vm7, %v4948_v27, %v1322_v50  ;;  %v3755_v48 = vshll.u32 %v5279_v46, 16  ;;  %v3779_v49 = vshll.u32 %v5282_v18, 16  ;;  %8053 = vst [vmem:[#allocation15_spill] sm:$0xff] %v7382_v25  ;;  %v7420_v2 = vld [vmem:[%s6315_s25 + $0x8c] sm:$0x1] }
  0xe5   : > { %5639 = vmatmul.mubr.msk.bf16.gmra.mrb[8].mxu1 %vm658_vm3, %v8048_v3  ;;  %5794 = vmatprep.mubr.msk.bf16.mxu0 %vm658_vm3, %v6176_v5  ;;  %v7359_v5 = vrot.slane %v3744_v4, 4  ;;  %v3785_v46 = vshll.u32 %v7355_v10, 16  ;;  %v3789_v34 = vshrl.u32 %v7355_v10, 16  ;;  %v3800_v4 = vshrl.u32 %v5285_v7, 16 }
  0xe6   : > { %5642 = vmatprep.mubr.msk.bf16.mxu1 %vm658_vm3, %v8050_v45  ;;  %v3803_v27 = vshll.u32 %v5285_v7, 16  ;;  %v3809_v3 = vshll.u32 %v7367_v31, 16  ;;  %v3813_v50 = vshrl.u32 %v7367_v31, 16  ;;  %v7392_v45 = vld [vmem:[%s6315_s25 + $0x74] sm:$0x1]  ;;  %v3757_v18 = vrot.slane %v3755_v48, 5 }
  0xe7   : > { %v3824_v52 = vshrl.u32 %v5288_v62, 16  ;;  %v3827_v53 = vshll.u32 %v5288_v62, 16  ;;  %v8054_v7 = vcombine.low %v7037_v60, %v7062_v44  ;;  %v3767_v59 = vrot.slane %v3765_v8, 4  ;;  %v5291_v48 = vld [vmem:[%s6315_s25 + $0x9c] sm:$0xf] }
  0xe8   : > { %v3833_v63 = vshll.u32 %v7382_v25, 16  ;;  %v3837_v23 = vshrl.u32 %v7382_v25, 16  ;;  %v8055_v62 = vcombine.low %v7077_v17, %v7081_v57  ;;  %v7410_v44 = vld [vmem:[%s6315_s25 + $0x80] sm:$0x1]  ;;  %v3778_v60 = vrot.slane %v3776_v26, 4 }
  0xe9   : > { %8056 = vst [vmem:[#allocation16_spill] sm:$0xff] %v7410_v44  ;;  %v3802_v31 = vrot.slane %v3800_v4, 4  ;;  %v3805_v8 = vrot.slane %v3803_v27, 5  ;;  %v7414_v10 = vrot.slane %v3809_v3, 5  ;;  %v3815_v51 = vrot.slane %v3813_v50, 4 }
  0xea   : > { %v7417_v25 = vld [vmem:[%s6315_s25 + $0xa0] sm:$0xf]  ;;  %v3826_v17 = vrot.slane %v3824_v52, 4  ;;  %v3829_v57 = vrot.slane %v3827_v53, 5  ;;  %v3851_v9 = vshll.u32 %v5291_v48, 16  ;;  %v3758_v26 = vor.u32 %v3757_v18, %v7375_v33 }
  0xeb   : > { %v3795_v27 = vshll.u32 %v7410_v44, 16  ;;  %v7429_v3 = vld [vmem:[%s6315_s25 + $0x98] sm:$0x1]  ;;  %v3857_v50 = vshll.u32 %v7417_v25, 16  ;;  %v3861_v52 = vshrl.u32 %v7417_v25, 16  ;;  %v3806_v22 = vor.u32 %v3805_v8, %v3802_v31 }
  0xec   : > { %5795 = vmatmul.mubr.msk.bf16.gmra.mrb[28].mxu0 %vm658_vm3, %v6177_v61  ;;  %v7400_v61 = vrot.slane %v3761_v6, 5  ;;  %v3791_v6 = vrot.slane %v3789_v34, 4  ;;  %v3839_v34 = vrot.slane %v3837_v23, 4  ;;  %v3819_v33 = vshll.u32 %v7420_v2, 16 }
  0xed   : > { %5643 = vmatmul.mubr.msk.bf16.gmra.mrb[12].mxu1 %vm658_vm3, %v8054_v7  ;;  %5800 = vmatprep.mubr.msk.bf16.mxu0 %vm658_vm3, %v7142_v20  ;;  %v3781_v7 = vrot.slane %v3779_v49, 5  ;;  %v7412_v20 = vrot.slane %v3785_v46, 5  ;;  %v3771_v49 = vshll.u32 %v7392_v45, 16  ;;  %v7424_v46 = vrot.slane %v3833_v63, 5 }
  0xee   : > { %5646 = vmatprep.mubr.msk.bf16.mxu1 %vm658_vm3, %v8055_v62  ;;  %v3848_v62 = vshrl.u32 %v5291_v48, 16  ;;  %v3768_v4 = vor.u32 %v3767_v59, %v7400_v61  ;;  %v3816_v23 = vor.u32 %v3815_v51, %v7414_v10  ;;  %v3830_v59 = vor.u32 %v3829_v57, %v3826_v17  ;;  %v7462_v57 = vld [vmem:[%s6315_s25 + $0xa4] sm:$0x1] }
  0xef   : > { %v3782_v53 = vor.u32 %v3781_v7, %v3778_v60  ;;  %v3792_v48 = vor.u32 %v3791_v6, %v7412_v20  ;;  %v3853_v18 = vrot.slane %v3851_v9, 5  ;;  %v8057_v44 = vcombine.low %v7089_v11, %v7093_v40 }
  0xf0   : > { %v3850_v63 = vrot.slane %v3848_v62, 4  ;;  %v8058_v31 = vrot.slane %v7351_v54, 5  ;;  %v3773_v51 = vrot.slane %v3771_v49, 5  ;;  %v3840_v60 = vor.u32 %v3839_v34, %v7424_v46  ;;  %v7465_v34 = vld [vmem:[%s6315_s25 + $0xac] sm:$0xf] }
  0xf1   : > { %v3843_v9 = vshll.u32 %v7429_v3, 16  ;;  %v8059_v11 = vcombine.low %v7161_v39, %v7165_v55  ;;  %v3759_v40 = vrot.slane %v3758_v26, 4  ;;  %v7458_v54 = vrot.slane %v3857_v50, 5 }
  0xf2   : > { %v3783_v7 = vrot.slane %v3782_v53, 4  ;;  %v3793_v6 = vrot.slane %v3792_v48, 4  ;;  %v3797_v8 = vrot.slane %v3795_v27, 5  ;;  %v3821_v17 = vrot.slane %v3819_v33, 5  ;;  %v7475_v48 = vld [vmem:[%s6315_s25 + $0xb0] sm:$0x1] }
  0xf3   : > { %v3807_v39 = vrot.slane %v3806_v22, 4  ;;  %v3817_v55 = vrot.slane %v3816_v23, 4  ;;  %v3831_v62 = vrot.slane %v3830_v59, 4  ;;  %v3854_v49 = vor.u32 %v3853_v18, %v3850_v63 }
  0xf4   : > { %5801 = vmatmul.mubr.msk.bf16.vlgmr.msra.gmra.mrb[0].mxu0 %vm658_vm3, %v7205_v16  ;;  %v7448_v16 = vsel %vm6567_vm7, %v7373_v28, %v8058_v31  ;;  %v3863_v28 = vrot.slane %v3861_v52, 4  ;;  %v3845_v26 = vrot.slane %v3843_v9, 5  ;;  %v3764_v52 = vsel %vm6341_vm4, %v3759_v40, %v7400_v61 }
  0xf5   : > { %5647 = vmatmul.mubr.msk.bf16.gmra.mrb[16].mxu1 %vm658_vm3, %v8057_v44  ;;  %5833 = vmatpush3.bf16.msra.mxu0 %v7146_v14  ;;  %v3769_v14 = vrot.slane %v3768_v4, 4  ;;  %v5294_v44 = vld [vmem:[%s6315_s25 + $0xa8] sm:$0xf]  ;;  %v3867_v22 = vshll.u32 %v7462_v57, 16  ;;  %v3788_v33 = vsel %vm6341_vm4, %v3783_v7, %v7412_v20  ;;  %v3798_v23 = vsel %vm6341_vm4, %v3793_v6, %v3797_v8 }
  0xf6   : > { %5650 = vmatprep.mubr.msk.bf16.mxu1 %vm658_vm3, %v8059_v11  ;;  %5804 = vmatprep.mubr.msk.bf16.mxu0 %vm658_vm3, %v7216_v29  ;;  %v3841_v29 = vrot.slane %v3840_v60, 4  ;;  %v3872_v4 = vshrl.u32 %v5294_v44, 16  ;;  %v3875_v50 = vshll.u32 %v5294_v44, 16  ;;  %v3864_v53 = vor.u32 %v3863_v28, %v7458_v54  ;;  %v5343_v11 = vld [vmem:[%s6315_s25 + $0x48] sm:$0xe] }
  0xf7   : > { %v3774_v27 = vsel %vm6341_vm4, %v3769_v14, %v3773_v51  ;;  %v3881_v59 = vshll.u32 %v7465_v34, 16  ;;  %v3885_v61 = vshrl.u32 %v7465_v34, 16  ;;  %v3812_v63 = vsel %vm6341_vm4, %v3807_v39, %v7414_v10  ;;  %v7540_v39 = vld [vmem:[%s6315_s25 + $0xb8] sm:$0xf] }
  0xf8   : > { %v3822_v18 = vsel %vm6341_vm4, %v3817_v55, %v3821_v17  ;;  %v3836_v20 = vsel %vm6341_vm4, %v3831_v62, %v7424_v46  ;;  %v3855_v31 = vrot.slane %v3854_v49, 4  ;;  %v8060_v51 = vcombine.low %v7178_v12, %v7193_v35 }
  0xf9   : > { %v3874_v10 = vrot.slane %v3872_v4, 4  ;;  %v3877_v60 = vrot.slane %v3875_v50, 5  ;;  %v3891_v9 = vshll.u32 %v7475_v48, 16  ;;  %v8061_v46 = vcombine.low %v7263_v21, %v7288_v56  ;;  %v5297_v21 = vld [vmem:[%s6315_s25 + $0xb4] sm:$0xf] }
  0xfa   : > { %v4964_v12 = vcombine.low %v7339_v42, %v7346_v47  ;;  %v8062_v35 = vsel %vm6341_vm4, %v7359_v5, %v7348_v41  ;;  %v3865_v14 = vrot.slane %v3864_v53, 4  ;;  %v3869_v28 = vrot.slane %v3867_v22, 5  ;;  %v5345_v4 = vld [vmem:[%s6315_s25 + $0x60] sm:$0xe]  ;;  %v5346_v53 = vld [vmem:[%s6315_s25 + $0x6c] sm:$0xe] }
  0xfb   : > { %v4965_v56 = vcombine.low %v7363_v43, %v7448_v16  ;;  %v7523_v44 = vcombine.low %v3764_v52, %v3774_v27  ;;  %v7525_v42 = vrot.slane %v3881_v59, 5  ;;  %v3887_v47 = vrot.slane %v3885_v61, 4  ;;  %v8071_v16 = vld [vmem:[#allocation4_spill] sm:$0xff] }
  0xfc   : > { %5805 = vmatmul.mubr.msk.bf16.gmra.mrb[4].mxu0 %vm658_vm3, %v7319_v37  ;;  %v3846_v37 = vsel %vm6341_vm4, %v3841_v29, %v3845_v26  ;;  %v7527_v41 = vcombine.low %v3788_v33, %v3798_v23  ;;  %v7529_v5 = vcombine.low %v3812_v63, %v3822_v18  ;;  %v3860_v6 = vsel %vm6341_vm4, %v3855_v31, %v7458_v54  ;;  %v8064_v23 = vld [vmem:[#allocation11_spill] sm:$0xff]  ;;  %v5300_v63 = vld [vmem:[%s6315_s25 + $0xc0] sm:$0xf]  ;;  %v8066_v18 = vld [vmem:[#allocation9_spill] sm:$0xff] }
  0xfd   : > { %5651 = vmatmul.mubr.msk.bf16.gmra.mrb[20].mxu1 %vm658_vm3, %v8060_v51  ;;  %5808 = vmatprep.mubr.msk.bf16.mxu0 %vm658_vm3, %v7333_v58  ;;  %v8063_v58 = vsel %vm6341_vm4, %v7321_v19, %v7276_v1  ;;  %v7531_v7 = vcombine.low %v3836_v20, %v3846_v37  ;;  %v5359_v1 = vrot.slane %v5343_v11, 9  ;;  %v5344_v19 = vld [vmem:[%s6315_s25 + $0x54] sm:$0xe]  ;;  %v3878_v8 = vor.u32 %v3877_v60, %v3874_v10  ;;  %v8067_v31 = vld [vmem:[#allocation10_spill] sm:$0xff] }
  0xfe   : > { %5654 = vmatprep.mubr.msk.bf16.mxu1 %vm658_vm3, %v8061_v46  ;;  %v5313_v40 = vcombine.low %v8063_v58, %v8062_v35  ;;  %v7537_v17 = vrot.slane %v3891_v9, 5  ;;  %v3896_v55 = vshrl.u32 %v5297_v21, 16  ;;  %v3870_v62 = vsel %vm6341_vm4, %v3865_v14, %v3869_v28  ;;  %v8068_v9 = vld [vmem:[#allocation12_spill] sm:$0xff]  ;;  %v7589_v35 = vld [vmem:[%s6315_s25 + $0xbc] sm:$0x1] }
  0xff   : > { %v3899_v49 = vshll.u32 %v5297_v21, 16  ;;  %v4355_v29 = vrot.slane %v7171_v0, 5  ;;  %v4358_v26 = vrot.slane %v7225_v38, 5  ;;  %v3888_v50 = vor.u32 %v3887_v47, %v7525_v42  ;;  %v7592_v58 = vld [vmem:[%s6315_s25 + $0xc4] sm:$0xf] }
 0x100   : > { %v5360_v52 = vrot.slane %v5344_v19, 9  ;;  %v4362_v54 = vrot.slane %v7182_v24, 5  ;;  %v4365_v27 = vrot.slane %v7234_v15, 5  ;;  %v3905_v22 = vshll.u32 %v7540_v39, 16  ;;  %v5347_v19 = vld [vmem:[%s6315_s25 + $0x78] sm:$0xe] }
 0x101   : > { %v3909_v33 = vshrl.u32 %v7540_v39, 16  ;;  %v7557_v0 = vsel %vm6567_vm7, %v5359_v1, %v4355_v29  ;;  %v4357_v38 = vrot.slane %v4355_v29, 4  ;;  %v8065_v59 = vcombine.low %v7296_v36, %v8064_v23  ;;  %v8069_v23 = vld [vmem:[#allocation13_spill] sm:$0xff] }
 0x102   : > { %v7564_v24 = vcombine.low %v3860_v6, %v3870_v62  ;;  %v7568_v15 = vsel %vm6567_vm7, %v5360_v52, %v4362_v54  ;;  %v5361_v61 = vrot.slane %v5345_v4, 9  ;;  %v4369_v20 = vrot.slane %v8066_v18, 5  ;;  %v6178_v6 = vld [vmem:[%s6315_s25 + $0xc] sm:$0xff]  }
 0x103   : > { %v7574_v36 = vsel %vm6567_vm7, %v4357_v38, %v4358_v26  ;;  %v4372_v51 = vrot.slane %v8067_v31, 5  ;;  %v5362_v37 = vrot.slane %v5346_v53, 9  ;;  %v4376_v11 = vrot.slane %v8068_v9, 5 }
 0x104   : > { %5809 = vmatmul.mubr.msk.bf16.gmra.mrb[8].mxu0 %vm658_vm3, %v7342_v30  ;;  %v4364_v30 = vrot.slane %v4362_v54, 4  ;;  %v5376_v10 = vcombine.low %v7557_v0, %v7574_v36  ;;  %v4379_v46 = vrot.slane %v7392_v45, 5  ;;  %v7598_v14 = vsel %vm6567_vm7, %v5361_v61, %v4369_v20 }
 0x105   : > { %5655 = vmatmul.mubr.msk.bf16.gmra.mrb[24].mxu1 %vm658_vm3, %v8065_v59  ;;  %5812 = vmatprep.mubr.msk.bf16.mxu0 %vm658_vm3, %v5313_v40  ;;  %v4371_v28 = vrot.slane %v4369_v20, 4  ;;  %v7600_v21 = vrot.slane %v3896_v55, 4  ;;  %v3920_v47 = vshrl.u32 %v5300_v63, 16  ;;  %v7604_v45 = vsel %vm6567_vm7, %v5362_v37, %v4376_v11  ;;  %v5074_v55 = vld [vmem:[%s6315_s25 + $0x78] sm:$0xf]  ;;  %v8070_v59 = vld [vmem:[#allocation16_spill] sm:$0xff] }
 0x106   : > { %5658 = vmatprep.mubr.msk.bf16.mxu1 %vm658_vm3, %v4964_v12  ;;  %v7582_v60 = vsel %vm6567_vm7, %v4364_v30, %v4365_v27  ;;  %v7586_v12 = vrot.slane %v3878_v8, 4  ;;  %v4378_v1 = vrot.slane %v4376_v11, 4  ;;  %v7608_v8 = vrot.slane %v3888_v50, 4 }
 0x107   : > { %v5377_v40 = vcombine.low %v7568_v15, %v7582_v60  ;;  %v7610_v62 = vrot.slane %v3899_v49, 5  ;;  %v3923_v29 = vshll.u32 %v5300_v63, 16  ;;  %v7614_v26 = vsel %vm6567_vm7, %v4371_v28, %v4372_v51  ;;  %v8073_v28 = vld [vmem:[#allocation14_spill] sm:$0xff] }
 0x108   : > { %v7617_v4 = vrot.slane %v3905_v22, 5  ;;  %v7619_v52 = vrot.slane %v3909_v33, 4  ;;  %v5378_v54 = vcombine.low %v7598_v14, %v7614_v26  ;;  %v7625_v27 = vsel %vm6567_vm7, %v4378_v1, %v4379_v46  ;;  %v5348_v33 = vld [vmem:[%s6315_s25 + $0x84] sm:$0xe]  ;;  %v6179_v1 = vld [vmem:[%s6315_s25 + $0x18] sm:$0xff]  }
 0x109   : > { %v3915_v49 = vshll.u32 %v7589_v35, 16  ;;  %v3929_v50 = vshll.u32 %v7592_v58, 16  ;;  %v5379_v53 = vcombine.low %v7604_v45, %v7625_v27  ;;  %v5363_v22 = vrot.slane %v5347_v19, 9  ;;  %v6241_v60 = vld [vmem:[%s6315_s25 + $0xa0] sm:$0xf] }
 0x10a   : > { %v3922_v38 = vrot.slane %v3920_v47, 4  ;;  %v4386_v30 = vrot.slane %v8070_v59, 5  ;;  %v2245_v61 = vshrl.u32 %v5074_v55, 16  ;;  %v3925_v63 = vrot.slane %v3923_v29, 5  ;;  %v5303_v29 = vld [vmem:[%s6315_s25 + $0xcc] sm:$0xf] }
 0x10b   : > { %v3933_v18 = vshrl.u32 %v7592_v58, 16  ;;  %v2248_v43 = vshll.u32 %v5074_v55, 16  ;;  %v5364_v37 = vrot.slane %v5348_v33, 9  ;;  %v3884_v9 = vsel %vm6341_vm4, %v7586_v12, %v7525_v42  ;;  %v7668_v55 = vld [vmem:[%s6315_s25 + $0xd0] sm:$0xf] }
 0x10c   : > { %5813 = vmatmul.mubr.msk.bf16.gmra.mrb[12].mxu0 %vm658_vm3, %v7523_v44  ;;  %v4383_v44 = vrot.slane %v8069_v23, 5  ;;  %v2247_v51 = vrot.slane %v2245_v61, 4  ;;  %v3902_v11 = vor.u32 %v7610_v62, %v7600_v21  ;;  %v4390_v47 = vrot.slane %v8073_v28, 5  ;;  %v6180_v21 = vld [vmem:[%s6315_s25 + $0x24] sm:$0xff]   ;;  %v6245_v27 = vld [vmem:[%s6315_s25 + $0xac] sm:$0xf] }
 0x10d   : > { %5659 = vmatmul.mubr.msk.bf16.gmra.mrb[28].mxu1 %vm658_vm3, %v4965_v56  ;;  %5816 = vmatprep.mubr.msk.bf16.mxu0 %vm658_vm3, %v7527_v41  ;;  %v8072_v56 = vld [vmem:[#allocation5_spill] sm:$0xff]  ;;  %v2250_v46 = vrot.slane %v2248_v43, 5  ;;  %v3894_v19 = vsel %vm6341_vm4, %v7608_v8, %v7537_v17  ;;  %v4393_v12 = vrot.slane %v7420_v2, 5  ;;  %v7676_v62 = vrot.slane %v3929_v50, 5  ;;  %v5349_v8 = vld [vmem:[%s6315_s25 + $0x90] sm:$0xe] }
 0x10e   : > { %5664 = vmatprep.mubr.msk.bf16.mxu1 %vm658_vm3, %v6178_v6  ;;  %v2267_v41 = vsel %vm6341_vm4, %v8072_v56, %v8071_v16  ;;  %v7650_v20 = vsel %vm6567_vm7, %v5363_v22, %v4383_v44  ;;  %v4385_v31 = vrot.slane %v4383_v44, 4  ;;  %v3912_v6 = vor.u32 %v7619_v52, %v7617_v4  ;;  %v7682_v52 = vld [vmem:[%s6315_s25 + $0xc8] sm:$0x1]  ;;  %v8075_v16 = vld [vmem:[#allocation2_spill] sm:$0xff] }
 0x10f   : > { %v3935_v22 = vrot.slane %v3933_v18, 4  ;;  %v2251_v17 = vor.u32 %v2250_v46, %v2247_v51  ;;  %v3917_v23 = vrot.slane %v3915_v49, 5  ;;  %v3926_v44 = vor.u32 %v3925_v63, %v3922_v38  ;;  %v8076_v51 = vld [vmem:[#allocation3_spill] sm:$0xff] }
 0x110   : > { %v7672_v42 = vsel %vm6567_vm7, %v4385_v31, %v4386_v30  ;;  %v7686_v59 = vsel %vm6567_vm7, %v5364_v37, %v4390_v47  ;;  %v4392_v30 = vrot.slane %v4390_v47, 4  ;;  %v3944_v2 = vshrl.u32 %v5303_v29, 16 }
 0x111   : > { %v5380_v33 = vcombine.low %v7650_v20, %v7672_v42  ;;  %v3947_v50 = vshll.u32 %v5303_v29, 16  ;;  %v3953_v61 = vshll.u32 %v7668_v55, 16  ;;  %v2252_v18 = vrot.slane %v2251_v17, 4  ;;  %v6181_v29 = vld [vmem:[%s6315_s25 + $0x30] sm:$0xff]  }
 0x112   : > { %v3957_v49 = vshrl.u32 %v7668_v55, 16  ;;  %v7697_v38 = vsel %vm6567_vm7, %v4392_v30, %v4393_v12  ;;  %v5365_v63 = vrot.slane %v5349_v8, 9  ;;  %v3936_v56 = vor.u32 %v3935_v22, %v7676_v62 }
 0x113   : > { %v3939_v31 = vshll.u32 %v7682_v52, 16  ;;  %v5381_v37 = vcombine.low %v7686_v59, %v7697_v38  ;;  %v5319_v46 = vcombine.low %v3884_v9, %v3894_v19  ;;  %v3903_v28 = vrot.slane %v3902_v11, 4  ;;  %v5350_v11 = vld [vmem:[%s6315_s25 + $0x9c] sm:$0xe] }
 0x114   : > { %5817 = vmatmul.mubr.msk.bf16.gmra.mrb[16].mxu0 %vm658_vm3, %v7529_v5  ;;  %v8074_v5 = vld [vmem:[#allocation15_spill] sm:$0xff]  ;;  %v3913_v47 = vrot.slane %v3912_v6, 4  ;;  %v3927_v12 = vrot.slane %v3926_v44, 4  ;;  %v4400_v8 = vrot.slane %v7429_v3, 5  ;;  %v3946_v30 = vrot.slane %v3944_v2, 4  ;;  %v6182_v19 = vld [vmem:[%s6315_s25 + $0x3c] sm:$0xff]  }
 0x115   : > { %5665 = vmatmul.mubr.msk.bf16.vlgmr.msra.gmra.mrb[0].mxu1 %vm658_vm3, %v6179_v1  ;;  %5820 = vmatprep.mubr.msk.bf16.mxu0 %vm658_vm3, %v7531_v7  ;;  %v4397_v43 = vrot.slane %v8074_v5, 5  ;;  %v2257_v7 = vsel %vm6341_vm4, %v2252_v18, %v8076_v51  ;;  %v3949_v18 = vrot.slane %v3947_v50, 5  ;;  %v7720_v5 = vrot.slane %v3953_v61, 5 }
 0x116   : > { %5867 = vmatpush3.bf16.msra.mxu1 %v8075_v16  ;;  %5668 = vmatprep.mubr.msk.bf16.mxu1 %vm658_vm3, %v6180_v21  ;;  %v7709_v1 = vcombine.low %v2257_v7, %v2267_v41  ;;  %v7713_v21 = vld [vmem:[%s6315_s25 + $0xd4] sm:$0x1]  ;;  %v3959_v9 = vrot.slane %v3957_v49, 4  ;;  %v3937_v41 = vrot.slane %v3936_v56, 4  ;;  %v3941_v6 = vrot.slane %v3939_v31, 5 }
 0x117   : > { %v7717_v22 = vsel %vm6567_vm7, %v5365_v63, %v4397_v43  ;;  %v4399_v17 = vrot.slane %v4397_v43, 4  ;;  %v3908_v63 = vsel %vm6341_vm4, %v3903_v28, %v7617_v4  ;;  %v3918_v2 = vsel %vm6341_vm4, %v3913_v47, %v3917_v23  ;;  %v6232_v16 = vld [vmem:[%s6315_s25 + $0x1c] sm:$0xf]  ;;  %v5351_v28 = vld [vmem:[%s6315_s25 + $0xa8] sm:$0xe] }
 0x118   : > { %v3963_v50 = vshll.u32 %v7713_v21, 16  ;;  %v5366_v61 = vrot.slane %v5350_v11, 9  ;;  %v4404_v49 = vrot.slane %v7417_v25, 5  ;;  %v3932_v4 = vsel %vm6341_vm4, %v3927_v12, %v7676_v62  ;;  %v5339_v62 = vld [vmem:[%s6315_s25 + $0x18] sm:$0xe]  ;;  %v6183_v47 = vld [vmem:[%s6315_s25 + $0x48] sm:$0xff]  }
 0x119   : > { %v7726_v44 = vsel %vm6567_vm7, %v4399_v17, %v4400_v8  ;;  %v3960_v43 = vor.u32 %v3959_v9, %v7720_v5  ;;  %v4407_v23 = vrot.slane %v7462_v57, 5  ;;  %v3942_v25 = vsel %vm6341_vm4, %v3937_v41, %v3941_v6  ;;  %v6233_v11 = vld [vmem:[%s6315_s25 + $0x20] sm:$0x1] }
 0x11a   : > { %v5382_v3 = vcombine.low %v7717_v22, %v7726_v44  ;;  %v4327_v56 = vrot.slane %v6232_v16, 5  ;;  %v7752_v31 = vsel %vm6567_vm7, %v5366_v61, %v4404_v49  ;;  %v4406_v51 = vrot.slane %v4404_v49, 4  ;;  %v5352_v49 = vld [vmem:[%s6315_s25 + $0xb4] sm:$0xe] }
 0x11b   : > { %v5320_v7 = vcombine.low %v3908_v63, %v3918_v2  ;;  %v3961_v17 = vrot.slane %v3960_v43, 4  ;;  %v5367_v41 = vrot.slane %v5351_v28, 9  ;;  %v4411_v6 = vrot.slane %v7465_v34, 5  ;;  %v5340_v2 = vld [vmem:[%s6315_s25 + $0x24] sm:$0xe] }
 0x11c   : > { %5821 = vmatmul.mubr.msk.bf16.gmra.mrb[20].mxu0 %vm658_vm3, %v7564_v24  ;;  %v3950_v24 = vor.u32 %v3949_v18, %v3946_v30  ;;  %v7757_v57 = vsel %vm6567_vm7, %v4406_v51, %v4407_v23  ;;  %v6184_v30 = vld [vmem:[%s6315_s25 + $0x54] sm:$0xff]   ;;  %v5355_v18 = vrot.slane %v5339_v62, 9  ;;  %v4329_v9 = vrot.slane %v4327_v56, 4  ;;  %v6236_v28 = vld [vmem:[%s6315_s25 + $0x2c] sm:$0x1] }
 0x11d   : > { %5669 = vmatmul.mubr.msk.bf16.gmra.mrb[4].mxu1 %vm658_vm3, %v6181_v29  ;;  %5824 = vmatprep.mubr.msk.bf16.mxu0 %vm658_vm3, %v5319_v46  ;;  %v3965_v46 = vrot.slane %v3963_v50, 5  ;;  %v5321_v29 = vcombine.low %v3932_v4, %v3942_v25  ;;  %v5383_v8 = vcombine.low %v7752_v31, %v7757_v57  ;;  %v4414_v63 = vrot.slane %v7475_v48, 5  ;;  %v6234_v50 = vld [vmem:[%s6315_s25 + $0x28] sm:$0xf]  ;;  %v5341_v25 = vld [vmem:[%s6315_s25 + $0x30] sm:$0xe] }
 0x11e   : > { %5672 = vmatprep.mubr.msk.bf16.mxu1 %vm658_vm3, %v6182_v19  ;;  %v3951_v12 = vrot.slane %v3950_v24, 4  ;;  %v4330_v19 = vrot.slane %v6233_v11, 5  ;;  %v4334_v61 = vrot.slane %v6234_v50, 5  ;;  %v7780_v48 = vsel %vm6567_vm7, %v5367_v41, %v4411_v6  ;;  %v6186_v11 = vld [vmem:[%s6315_s25 + $0x6c] sm:$0xff]   ;;  %v8077_v41 = vld [vmem:[#allocation6_spill] sm:$0xff] }
 0x11f   : > { %v3966_v34 = vsel %vm6341_vm4, %v3961_v17, %v3965_v46  ;;  %v4413_v24 = vrot.slane %v4411_v6, 4  ;;  %v4328_v43 = vsel %vm6567_vm7, %v5355_v18, %v4327_v56  ;;  %v5356_v51 = vrot.slane %v5340_v2, 9  ;;  %v5353_v50 = vld [vmem:[%s6315_s25 + $0xc0] sm:$0xe]  ;;  %v6250_v31 = vld [vmem:[%s6315_s25 + $0xc8] sm:$0x1] }
 0x120   : > { %v3956_v4 = vsel %vm6341_vm4, %v3951_v12, %v7720_v5  ;;  %v4331_v23 = vsel %vm6567_vm7, %v4329_v9, %v4330_v19  ;;  %v6235_v5 = vld [vmem:[%s6315_s25 + $0x34] sm:$0xf]  ;;  %v6185_v12 = vld [vmem:[%s6315_s25 + $0x60] sm:$0xff]   ;;  %v5357_v18 = vrot.slane %v5341_v25, 9  ;;  %v4421_v9 = vrot.slane %v7589_v35, 5 }
 0x121   : > { %v4341_v16 = vrot.slane %v6235_v5, 5  ;;  %v7791_v62 = vsel %vm6567_vm7, %v4413_v24, %v4414_v63  ;;  %v5322_v46 = vcombine.low %v3956_v4, %v3966_v34  ;;  %v5372_v17 = vcombine.low %v4328_v43, %v4331_v23  ;;  %v5342_v24 = vld [vmem:[%s6315_s25 + $0x3c] sm:$0xe] }
 0x122   : > { %v5384_v56 = vcombine.low %v7780_v48, %v7791_v62  ;;  %v4344_v6 = vrot.slane %v8077_v41, 5  ;;  %v4335_v35 = vsel %vm6567_vm7, %v5356_v51, %v4334_v61  ;;  %v5369_v5 = vrot.slane %v5353_v50, 9 }
 0x123   : > { %v4343_v19 = vrot.slane %v4341_v16, 4  ;;  %v4342_v23 = vsel %vm6567_vm7, %v5357_v18, %v4341_v16  ;;  %v4428_v51 = vrot.slane %v7682_v52, 5  ;;  %v2408_v57 = vshll.u32 %v6250_v31, 16 }
 0x124   : > { %5825 = vmatmul.mubr.msk.bf16.gmra.mrb[24].mxu0 %vm658_vm3, %v5320_v7  ;;  %v5368_v7 = vrot.slane %v5352_v49, 9 }
 0x125   : > { %5673 = vmatmul.mubr.msk.bf16.gmra.mrb[8].mxu1 %vm658_vm3, %v6183_v47  ;;  %5828 = vmatprep.mubr.msk.bf16.mxu0 %vm658_vm3, %v5321_v29  ;;  %v4337_v47 = vrot.slane %v6236_v28, 5  ;;  %v4418_v29 = vrot.slane %v7540_v39, 5  ;;  %v8078_v39 = vld [vmem:[#allocation7_spill] sm:$0xff]  ;;  %v4345_v25 = vsel %vm6567_vm7, %v4343_v19, %v4344_v6  ;;  %v5358_v28 = vrot.slane %v5342_v24, 9 }
 0x126   : > { %5676 = vmatprep.mubr.msk.bf16.mxu1 %vm658_vm3, %v6184_v30  ;;  %v4336_v30 = vrot.slane %v4334_v61, 4  ;;  %v4348_v49 = vrot.slane %v8078_v39, 5  ;;  %v4425_v61 = vrot.slane %v7592_v58, 5  ;;  %v6237_v39 = vld [vmem:[%s6315_s25 + $0x70] sm:$0xf]  ;;  %v4432_v24 = vrot.slane %v7668_v55, 5 }
 0x127   : > { %v7803_v63 = vsel %vm6567_vm7, %v5368_v7, %v4418_v29  ;;  %v4420_v2 = vrot.slane %v4418_v29, 4  ;;  %v5071_v7 = vld [vmem:[%s6315_s25 + $0x6c] sm:$0xf]  ;;  %v8079_v29 = vld [vmem:[#allocation8_spill] sm:$0xff] }
 0x128   : > { %v4338_v34 = vsel %vm6567_vm7, %v4336_v30, %v4337_v47  ;;  %v4350_v47 = vrot.slane %v4348_v49, 4  ;;  %v6187_v30 = vld [vmem:[%s6315_s25 + $0x78] sm:$0xff]   ;;  %v7834_v16 = vsel %vm6567_vm7, %v5369_v5, %v4425_v61  ;;  %v4427_v18 = vrot.slane %v4425_v61, 4 }
 0x129   : > { %v7810_v4 = vsel %vm6567_vm7, %v4420_v2, %v4421_v9  ;;  %v5374_v9 = vcombine.low %v4342_v23, %v4345_v25  ;;  %v2221_v19 = vshrl.u32 %v5071_v7, 16  ;;  %v2224_v41 = vshll.u32 %v5071_v7, 16 }
 0x12a   : > { %v5385_v43 = vcombine.low %v7803_v63, %v7810_v4  ;;  %v7839_v58 = vsel %vm6567_vm7, %v4427_v18, %v4428_v51  ;;  %v4349_v6 = vsel %vm6567_vm7, %v5358_v28, %v4348_v49  ;;  %v4435_v49 = vrot.slane %v7713_v21, 5  ;;  %v6189_v51 = vld [vmem:[%s6315_s25 + $0x90] sm:$0xff]   ;;  %v6190_v21 = vld [vmem:[%s6315_s25 + $0x9c] sm:$0xff]  }
 0x12b   : > { %v5386_v50 = vcombine.low %v7834_v16, %v7839_v58  ;;  %v2223_v23 = vrot.slane %v2221_v19, 4  ;;  %v2226_v25 = vrot.slane %v2224_v41, 5  ;;  %v4434_v7 = vrot.slane %v4432_v24, 4  ;;  %v4795_v4 = vld [vmem:[%s8011_s2] sm:$0xff] }
 0x12c   : > { %5829 = vmatmul.mubr.msk.bf16.gmra.mrb[28].mxu0 %vm658_vm3, %v5322_v46  ;;  %v5373_v46 = vcombine.low %v4335_v35, %v4338_v34  ;;  %v2230_v35 = vshll.u32 %v6237_v39, 16  ;;  %v2234_v34 = vshrl.u32 %v6237_v39, 16  ;;  %v6259_v63 = vmov 0  }
 0x12d   : > { %5677 = vmatmul.mubr.msk.bf16.gmra.mrb[12].mxu1 %vm658_vm3, %v6185_v12  ;;  %5834 = vmatprep.mubr.msk.bf16.mxu0 %vm658_vm3, %v5372_v17  ;;  %v4351_v12 = vrot.slane %v8079_v29, 5  ;;  %v5354_v17 = vld [vmem:[%s6315_s25 + $0xcc] sm:$0xe]  ;;  %v7861_v55 = vsel %vm6567_vm7, %v4434_v7, %v4435_v49 }
 0x12e   : > { %5680 = vmatprep.mubr.msk.bf16.mxu1 %vm658_vm3, %v6186_v11  ;;  %v6188_v11 = vld [vmem:[%s6315_s25 + $0x84] sm:$0xff]   ;;  %v5370_v52 = vrot.slane %v5354_v17, 9  ;;  %v2236_v28 = vrot.slane %v2234_v34, 4  ;;  %v6238_v17 = vld [vmem:[%s6315_s25 + $0x74] sm:$0x1]  ;;  %6144 = vset.pattern.permute.xlu1 %v6259_v63 }
 0x12f   : > { %v4352_v2 = vsel %vm6567_vm7, %v4350_v47, %v4351_v12  ;;  %v5077_v47 = vld [vmem:[%s6315_s25 + $0x84] sm:$0xf]  ;;  %v2227_v12 = vor.u32 %v2226_v25, %v2223_v23  ;;  %v6192_v34 = vld [vmem:[%s6315_s25 + $0xb4] sm:$0xff]   ;;  %4798 = vperm.xlu1 %6144, %v4795_v4  }
 0x130   : > { %v7856_v5 = vsel %vm6567_vm7, %v5370_v52, %v4432_v24  ;;  %v5375_v61 = vcombine.low %v4349_v6, %v4352_v2  ;;  %v2272_v18 = vshll.u32 %v5077_v47, 16  ;;  %v5080_v6 = vld [vmem:[%s6315_s25 + $0x90] sm:$0xf]  ;;  %v6191_v2 = vld [vmem:[%s6315_s25 + $0xa8] sm:$0xff]  }
 0x131   : > { %v5387_v29 = vcombine.low %v7856_v5, %v7861_v55  ;;  %v2228_v52 = vrot.slane %v2227_v12, 4  ;;  %v2293_v23 = vshrl.u32 %v5080_v6, 16  ;;  %v2296_v25 = vshll.u32 %v5080_v6, 16 }
 0x132   : > { %v2326_v12 = vshll.u32 %v6241_v60, 16 }
 0x133   : > { %v2298_v14 = vrot.slane %v2296_v25, 5  ;;  %v6244_v25 = vld [vmem:[%s6315_s25 + $0xa4] sm:$0x1] }
 0x134   : > { %5835 = vmatmul.mubr.msk.bf16.vlgmr.msra.gmra.mrb[0].mxu0 %vm658_vm3, %v5373_v46  ;;  %v2232_v46 = vrot.slane %v2230_v35, 5  ;;  %v5083_v35 = vld [vmem:[%s6315_s25 + $0x9c] sm:$0xf]  ;;  %v7903_v6 = vrot.slane %v2326_v12, 5 }
 0x135   : > { %5681 = vmatmul.mubr.msk.bf16.gmra.mrb[16].mxu1 %vm658_vm3, %v6187_v30  ;;  %5838 = vmatprep.mubr.msk.bf16.mxu0 %vm658_vm3, %v5374_v9  ;;  %v2240_v30 = vshll.u32 %v6238_v17, 16  ;;  %v2269_v9 = vshrl.u32 %v5077_v47, 16  ;;  %v2320_v47 = vshll.u32 %v5083_v35, 16  ;;  %v6242_v17 = vld [vmem:[%s6315_s25 + $0x8c] sm:$0x1] }
 0x136   : > { %5684 = vmatprep.mubr.msk.bf16.mxu1 %vm658_vm3, %v6188_v11  ;;  %v2237_v13 = vor.u32 %v2236_v28, %v2232_v46  ;;  %v6239_v11 = vld [vmem:[%s6315_s25 + $0x88] sm:$0xf]  ;;  %v2233_v7 = vsel %vm6341_vm4, %v2228_v52, %v2232_v46 }
 0x137   : > { %v2278_v19 = vshll.u32 %v6239_v11, 16  ;;  %v2282_v41 = vshrl.u32 %v6239_v11, 16  ;;  %v2242_v0 = vrot.slane %v2240_v30, 5  ;;  %v2271_v36 = vrot.slane %v2269_v9, 4 }
 0x138   : > { %v2238_v39 = vrot.slane %v2237_v13, 4  ;;  %v2288_v30 = vshll.u32 %v6242_v17, 16  ;;  %v2295_v9 = vrot.slane %v2293_v23, 4  ;;  %v2322_v11 = vrot.slane %v2320_v47, 5 }
 0x139   : > { %v7880_v24 = vrot.slane %v2278_v19, 5  ;;  %v2284_v49 = vrot.slane %v2282_v41, 4  ;;  %v6193_v19 = vld [vmem:[%s6315_s25 + $0xc0] sm:$0xff]  }
 0x13a   : > { %v2243_v46 = vsel %vm6341_vm4, %v2238_v39, %v2242_v0  ;;  %v5086_v39 = vld [vmem:[%s6315_s25 + $0xa8] sm:$0xf] }
 0x13b   : > { %v2285_v13 = vor.u32 %v2284_v49, %v7880_v24  ;;  %v5104_v41 = vcombine.low %v2233_v7, %v2243_v46  ;;  %v2336_v7 = vshll.u32 %v6244_v25, 16  ;;  %v2344_v45 = vshll.u32 %v5086_v39, 16 }
 0x13c   : > { %5839 = vmatmul.mubr.msk.bf16.gmra.mrb[4].mxu0 %vm658_vm3, %v5375_v61  ;;  %v6240_v61 = vld [vmem:[%s6315_s25 + $0x94] sm:$0xf] }
 0x13d   : > { %5685 = vmatmul.mubr.msk.bf16.gmra.mrb[20].mxu1 %vm658_vm3, %v6189_v51  ;;  %5842 = vmatprep.mubr.msk.bf16.mxu0 %vm658_vm3, %v5376_v10  ;;  %v2274_v10 = vrot.slane %v2272_v18, 5  ;;  %v2302_v51 = vshll.u32 %v6240_v61, 16  ;;  %v2306_v28 = vshrl.u32 %v6240_v61, 16  ;;  %v2286_v0 = vrot.slane %v2285_v13, 4 }
 0x13e   : > { %5688 = vmatprep.mubr.msk.bf16.mxu1 %vm658_vm3, %v6190_v21  ;;  %v2317_v21 = vshrl.u32 %v5083_v35, 16  ;;  %v6243_v35 = vld [vmem:[%s6315_s25 + $0x98] sm:$0x1]  ;;  %v2341_v61 = vshrl.u32 %v5086_v39, 16  ;;  %v5092_v39 = vld [vmem:[%s6315_s25 + $0xc0] sm:$0xf] }
 0x13f   : > { %v2275_v15 = vor.u32 %v2274_v10, %v2271_v36  ;;  %v7900_v26 = vrot.slane %v2302_v51, 5  ;;  %v2290_v36 = vrot.slane %v2288_v30, 5  ;;  %v2299_v10 = vor.u32 %v2298_v14, %v2295_v9  ;;  %v5089_v51 = vld [vmem:[%s6315_s25 + $0xb4] sm:$0xf] }
 0x140   : > { %v2319_v18 = vrot.slane %v2317_v21, 4  ;;  %v2354_v21 = vshrl.u32 %v6245_v27, 16  ;;  %v2365_v20 = vshrl.u32 %v5089_v51, 16  ;;  %v2368_v42 = vshll.u32 %v5089_v51, 16 }
 0x141   : > { %v2276_v52 = vrot.slane %v2275_v15, 4  ;;  %v2291_v46 = vsel %vm6341_vm4, %v2286_v0, %v2290_v36  ;;  %v2300_v15 = vrot.slane %v2299_v10, 4  ;;  %v2338_v30 = vrot.slane %v2336_v7, 5 }
 0x142   : > { %v2323_v23 = vor.u32 %v2322_v11, %v2319_v18  ;;  %v2343_v9 = vrot.slane %v2341_v61, 4  ;;  %v2356_v11 = vrot.slane %v2354_v21, 4  ;;  %v6249_v61 = vld [vmem:[%s6315_s25 + $0xbc] sm:$0x1] }
 0x143   : > { %v2281_v47 = vsel %vm6341_vm4, %v2276_v52, %v7880_v24  ;;  %v2305_v0 = vsel %vm6341_vm4, %v2300_v15, %v7900_v26  ;;  %v2384_v22 = vshll.u32 %v6249_v61, 16 }
 0x144   : > { %5843 = vmatmul.mubr.msk.bf16.gmra.mrb[8].mxu0 %vm658_vm3, %v5377_v40  ;;  %v2330_v40 = vshrl.u32 %v6241_v60, 16  ;;  %v2324_v17 = vrot.slane %v2323_v23, 4  ;;  %v5106_v24 = vcombine.low %v2281_v47, %v2291_v46 }
 0x145   : > { %5689 = vmatmul.mubr.msk.bf16.gmra.mrb[24].mxu1 %vm658_vm3, %v6191_v2  ;;  %5846 = vmatprep.mubr.msk.bf16.mxu0 %vm658_vm3, %v5378_v54  ;;  %v2308_v54 = vrot.slane %v2306_v28, 4 }
 0x146   : > { %5692 = vmatprep.mubr.msk.bf16.mxu1 %vm658_vm3, %v6192_v34  ;;  %v2332_v2 = vrot.slane %v2330_v40, 4  ;;  %v2312_v34 = vshll.u32 %v6243_v35, 16  ;;  %v2329_v10 = vsel %vm6341_vm4, %v2324_v17, %v7903_v6  ;;  %v2410_v17 = vrot.slane %v2408_v57, 5 }
 0x147   : > { %v2309_v49 = vor.u32 %v2308_v54, %v7900_v26  ;;  %v2346_v54 = vrot.slane %v2344_v45, 5  ;;  %v6247_v26 = vld [vmem:[%s6315_s25 + $0xb0] sm:$0x1] }
 0x148   : > { %v2333_v28 = vor.u32 %v2332_v2, %v7903_v6  ;;  %v2314_v60 = vrot.slane %v2312_v34, 5  ;;  %v2360_v35 = vshll.u32 %v6247_v26, 16  ;;  %v2389_v34 = vshrl.u32 %v5092_v39, 16 }
 0x149   : > { %v2310_v13 = vrot.slane %v2309_v49, 4  ;;  %v2347_v38 = vor.u32 %v2346_v54, %v2343_v9  ;;  %v2392_v6 = vshll.u32 %v5092_v39, 16  ;;  %v6248_v49 = vld [vmem:[%s6315_s25 + $0xc4] sm:$0xf] }
 0x14a   : > { %v2334_v14 = vrot.slane %v2333_v28, 4  ;;  %v2398_v23 = vshll.u32 %v6248_v49, 16  ;;  %v2402_v25 = vshrl.u32 %v6248_v49, 16  ;;  %v2362_v45 = vrot.slane %v2360_v35, 5 }
 0x14b   : > { %v2315_v36 = vsel %vm6341_vm4, %v2310_v13, %v2314_v60  ;;  %v2348_v51 = vrot.slane %v2347_v38, 4  ;;  %v2386_v60 = vrot.slane %v2384_v22, 5 }
 0x14c   : > { %5847 = vmatmul.mubr.msk.bf16.gmra.mrb[12].mxu0 %vm658_vm3, %v5379_v53  ;;  %v2350_v53 = vshll.u32 %v6245_v27, 16  ;;  %v2339_v59 = vsel %vm6341_vm4, %v2334_v14, %v2338_v30  ;;  %v5107_v44 = vcombine.low %v2305_v0, %v2315_v36  ;;  %v2391_v27 = vrot.slane %v2389_v34, 4 }
 0x14d   : > { %5693 = vmatmul.mubr.msk.bf16.gmra.mrb[28].mxu1 %vm658_vm3, %v6193_v19  ;;  %5850 = vmatprep.mubr.msk.bf16.mxu0 %vm658_vm3, %v5380_v33  ;;  %v6246_v33 = vld [vmem:[%s6315_s25 + $0xb8] sm:$0xf]  ;;  %v2367_v19 = vrot.slane %v2365_v20, 4  ;;  %v2400_v21 = vrot.slane %v2398_v23, 5  ;;  %v2404_v47 = vrot.slane %v2402_v25, 4 }
 0x14e   : > { %5714 = vmatprep.mubr.msk.bf16.mxu1 %vm658_vm3, %v5104_v41  ;;  %v2374_v12 = vshll.u32 %v6246_v33, 16  ;;  %v2378_v40 = vshrl.u32 %v6246_v33, 16  ;;  %v2352_v18 = vrot.slane %v2350_v53, 5  ;;  %v2370_v41 = vrot.slane %v2368_v42, 5 }
 0x14f   : > { %v2394_v53 = vrot.slane %v2392_v6, 5 }
 0x150   : > { %v2376_v52 = vrot.slane %v2374_v12, 5  ;;  %v2380_v2 = vrot.slane %v2378_v40, 4  ;;  %v2353_v20 = vsel %vm6341_vm4, %v2348_v51, %v2352_v18  ;;  %v2405_v12 = vor.u32 %v2404_v47, %v2400_v21 }
 0x151   : > { %v2395_v33 = vor.u32 %v2394_v53, %v2391_v27 }
 0x152   : > { %v2381_v7 = vor.u32 %v2380_v2, %v2376_v52  ;;  %v2406_v13 = vrot.slane %v2405_v12, 4 }
 0x153   : > { %v2396_v40 = vrot.slane %v2395_v33, 4 }
 0x154   : > { %5851 = vmatmul.mubr.msk.bf16.gmra.mrb[16].mxu0 %vm658_vm3, %v5381_v37  ;;  %v2357_v37 = vor.u32 %v2356_v11, %v2352_v18  ;;  %v2382_v15 = vrot.slane %v2381_v7, 4  ;;  %v2411_v9 = vsel %vm6341_vm4, %v2406_v13, %v2410_v17 }
 0x155   : > { %5715 = vmatmul.mubr.msk.bf16.vlgmr.msra.gmra.mrb[16].mxu1 %vm658_vm3, %v7709_v1  ;;  %5854 = vmatprep.mubr.msk.bf16.mxu0 %vm658_vm3, %v5382_v3  ;;  %v2371_v1 = vor.u32 %v2370_v41, %v2367_v19  ;;  %v5108_v3 = vcombine.low %v2329_v10, %v2339_v59  ;;  %v2401_v30 = vsel %vm6341_vm4, %v2396_v40, %v2400_v21 }
 0x156   : > { %5718 = vmatprep.mubr.msk.bf16.mxu1 %vm658_vm3, %v5106_v24  ;;  %v2358_v28 = vrot.slane %v2357_v37, 4  ;;  %v2387_v48 = vsel %vm6341_vm4, %v2382_v15, %v2386_v60  ;;  %v5111_v14 = vcombine.low %v2401_v30, %v2411_v9 }
 0x157   : > { %v2372_v46 = vrot.slane %v2371_v1, 4 }
 0x158   : > { %v2363_v42 = vsel %vm6341_vm4, %v2358_v28, %v2362_v45 }
 0x159   : > { %v5109_v62 = vcombine.low %v2353_v20, %v2363_v42 }
 0x15c   : > { %5855 = vmatmul.mubr.msk.bf16.gmra.mrb[20].mxu0 %vm658_vm3, %v5383_v8  ;;  %v2377_v8 = vsel %vm6341_vm4, %v2372_v46, %v2376_v52 }
 0x15d   : > { %5719 = vmatmul.mubr.msk.bf16.gmra.mrb[20].mxu1 %vm658_vm3, %v5107_v44  ;;  %5858 = vmatprep.mubr.msk.bf16.mxu0 %vm658_vm3, %v5384_v56  ;;  %v5110_v56 = vcombine.low %v2377_v8, %v2387_v48 }
 0x15e   : > { %5722 = vmatprep.mubr.msk.bf16.mxu1 %vm658_vm3, %v5108_v3 }
 0x164   : > { %5859 = vmatmul.mubr.msk.bf16.gmra.mrb[24].mxu0 %vm658_vm3, %v5385_v43 }
 0x165   : > { %5723 = vmatmul.mubr.msk.bf16.gmra.mrb[24].mxu1 %vm658_vm3, %v5109_v62  ;;  %5862 = vmatprep.mubr.msk.bf16.mxu0 %vm658_vm3, %v5386_v50 }
 0x166   : > { %5726 = vmatprep.mubr.msk.bf16.mxu1 %vm658_vm3, %v5110_v56 }
 0x16c   : > { %5863 = vmatmul.mubr.msk.bf16.gmra.mrb[28].mxu0 %vm658_vm3, %v5387_v29 }
 0x16d   : > { %5727 = vmatmul.mubr.msk.bf16.gmra.mrb[28].mxu1 %vm658_vm3, %v5111_v14 }
 0x1e8   : > { %v5666_v43 = vpop.f32.mrb[0].mxu1 }
 0x1e9   : > { %v1821_v16 = vpop.f32.mrb[1].mxu1 }
 0x1ea   : > { %v5667_v32 = vpop.f32.mrb[2].mxu1 }
 0x1eb   : > { %v1824_v58 = vpop.f32.mrb[3].mxu1 }
 0x1f0   : > { %v5670_v50 = vpop.f32.mrb[4].mxu1 }
 0x1f1   : > { %v1837_v54 = vpop.f32.mrb[5].mxu1 }
 0x1f2   : > { %v5671_v18 = vpop.f32.mrb[6].mxu1 }
 0x1f3   : > { %v1840_v5 = vpop.f32.mrb[7].mxu1 }
 0x1f8   : > { %v5674_v55 = vpop.f32.mrb[8].mxu1 }
 0x1f9   : > { %v1853_v29 = vpop.f32.mrb[9].mxu1 }
 0x1fa   : > { %v5675_v11 = vpop.f32.mrb[10].mxu1 }
 0x1fb   : > { %v1856_v24 = vpop.f32.mrb[11].mxu1 }
 0x200   : > { %v5678_v19 = vpop.f32.mrb[12].mxu1 }
 0x201   : > { %v1869_v41 = vpop.f32.mrb[13].mxu1 }
 0x202   : > { %v5679_v52 = vpop.f32.mrb[14].mxu1 }
 0x203   : > { %v1872_v2 = vpop.f32.mrb[15].mxu1 }
 0x207   : > { %v5836_v39 = vpop.f32.mrb[0].mxu0 }
 0x208   : > { %v5868_v0 = vadd.f32 %v5836_v39, %v5666_v43  ;;  %v4572_v36 = vpop.f32.mrb[1].mxu0 }
 0x209   : > { %v5837_v10 = vpop.f32.mrb[2].mxu0  ;;  %v5869_v59 = vadd.f32 %v4572_v36, %v1821_v16 }
 0x20a   : > { %v5870_v38 = vadd.f32 %v5837_v10, %v5667_v32  ;;  %v4575_v37 = vpop.f32.mrb[3].mxu0 }
 0x20b   : > { %v5871_v26 = vadd.f32 %v4575_v37, %v1824_v58  ;;  %4731 = vxpose.xlu0.b32.start [1/16] (narrow) %v5869_v59, 8 }
 0x20f   : > { %v5840_v35 = vpop.f32.mrb[4].mxu0  ;;  %4732 = vxpose.xlu0.b32.cont [2/16] (narrow) %v5871_v26, 8 }
 0x210   : > { %v5872_v34 = vadd.f32 %v5840_v35, %v5670_v50  ;;  %v4588_v6 = vpop.f32.mrb[5].mxu0 }
 0x211   : > { %v5873_v49 = vadd.f32 %v4588_v6, %v1837_v54  ;;  %v5841_v23 = vpop.f32.mrb[6].mxu0 }
 0x212   : > { %v5874_v25 = vadd.f32 %v5841_v23, %v5671_v18  ;;  %v4591_v1 = vpop.f32.mrb[7].mxu0 }
 0x213   : > { %v5875_v7 = vadd.f32 %v4591_v1, %v1840_v5  ;;  %4733 = vxpose.xlu0.b32.cont [3/16] (narrow) %v5868_v0, 8 }
 0x217   : > { %v5844_v61 = vpop.f32.mrb[8].mxu0  ;;  %4734 = vxpose.xlu0.b32.cont [4/16] (narrow) %v5870_v38, 8 }
 0x218   : > { %v5876_v22 = vadd.f32 %v5844_v61, %v5674_v55  ;;  %v4604_v44 = vpop.f32.mrb[9].mxu0 }
 0x219   : > { %v5877_v3 = vadd.f32 %v4604_v44, %v1853_v29  ;;  %v5845_v51 = vpop.f32.mrb[10].mxu0 }
 0x21a   : > { %v5878_v28 = vadd.f32 %v5845_v51, %v5675_v11  ;;  %v4607_v45 = vpop.f32.mrb[11].mxu0 }
 0x21b   : > { %v5879_v27 = vadd.f32 %v4607_v45, %v1856_v24  ;;  %4735 = vxpose.xlu0.b32.cont [5/16] (narrow) %v5873_v49, 8 }
 0x21f   : > { %v5848_v53 = vpop.f32.mrb[12].mxu0  ;;  %4736 = vxpose.xlu0.b32.cont [6/16] (narrow) %v5875_v7, 8 }
 0x220   : > { %v7995_v21 = vadd.f32 %v5848_v53, %v5678_v19  ;;  %v4620_v47 = vpop.f32.mrb[13].mxu0 }
 0x221   : > { %v5881_v46 = vadd.f32 %v4620_v47, %v1869_v41  ;;  %v5849_v15 = vpop.f32.mrb[14].mxu0 }
 0x222   : > { %v7997_v60 = vadd.f32 %v5849_v15, %v5679_v52  ;;  %v4623_v20 = vpop.f32.mrb[15].mxu0 }
 0x223   : > { %v5883_v42 = vadd.f32 %v4623_v20, %v1872_v2  ;;  %4737 = vxpose.xlu0.b32.cont [7/16] (narrow) %v5872_v34, 8 }
 0x227   : > { %v5852_v33 = vpop.f32.mrb[16].mxu0  ;;  %4738 = vxpose.xlu0.b32.cont [8/16] (narrow) %v5874_v25, 8 }
 0x228   : > { %v5716_v12 = vpop.f32.mrb[16].mxu1  ;;  %v4636_v31 = vpop.f32.mrb[17].mxu0 }
 0x229   : > { %v5884_v57 = vadd.f32 %v5852_v33, %v5716_v12  ;;  %v2611_v8 = vpop.f32.mrb[17].mxu1  ;;  %v5853_v48 = vpop.f32.mrb[18].mxu0 }
 0x22a   : > { %v5885_v62 = vadd.f32 %v4636_v31, %v2611_v8  ;;  %v5717_v56 = vpop.f32.mrb[18].mxu1  ;;  %v4639_v40 = vpop.f32.mrb[19].mxu0 }
 0x22b   : > { %v5886_v13 = vadd.f32 %v5853_v48, %v5717_v56  ;;  %v2614_v17 = vpop.f32.mrb[19].mxu1  ;;  %4739 = vxpose.xlu0.b32.cont [9/16] (narrow) %v5877_v3, 8 }
 0x22c   : > { %v5887_v30 = vadd.f32 %v4639_v40, %v2614_v17  ;;  %4763 = vxpose.xlu1.b32.start [1/16] (narrow) %v5885_v62, 8 }
 0x22f   : > { %v5856_v9 = vpop.f32.mrb[20].mxu0  ;;  %4740 = vxpose.xlu0.b32.cont [10/16] (narrow) %v5879_v27, 8 }
 0x230   : > { %4764 = vxpose.xlu1.b32.cont [2/16] (narrow) %v5887_v30, 8  ;;  %v5720_v14 = vpop.f32.mrb[20].mxu1  ;;  %v4652_v4 = vpop.f32.mrb[21].mxu0 }
 0x231   : > { %v5888_v43 = vadd.f32 %v5856_v9, %v5720_v14  ;;  %v2627_v16 = vpop.f32.mrb[21].mxu1  ;;  %v5857_v32 = vpop.f32.mrb[22].mxu0 }
 0x232   : > { %v5889_v58 = vadd.f32 %v4652_v4, %v2627_v16  ;;  %v5721_v50 = vpop.f32.mrb[22].mxu1  ;;  %v4655_v54 = vpop.f32.mrb[23].mxu0 }
 0x233   : > { %v5890_v18 = vadd.f32 %v5857_v32, %v5721_v50  ;;  %v2630_v5 = vpop.f32.mrb[23].mxu1  ;;  %4741 = vxpose.xlu0.b32.cont [11/16] (narrow) %v5876_v22, 8  ;;  %v4799_v22 = vpop.permute.xlu1 %4798 }
 0x234   : > { %v5891_v55 = vadd.f32 %v4655_v54, %v2630_v5  ;;  %4765 = vxpose.xlu1.b32.cont [3/16] (narrow) %v5884_v57, 8 }
 0x237   : > { %v5860_v29 = vpop.f32.mrb[24].mxu0  ;;  %4742 = vxpose.xlu0.b32.cont [12/16] (narrow) %v5878_v28, 8 }
 0x238   : > { %4766 = vxpose.xlu1.b32.cont [4/16] (narrow) %v5886_v13, 8  ;;  %v5724_v11 = vpop.f32.mrb[24].mxu1  ;;  %v4668_v24 = vpop.f32.mrb[25].mxu0 }
 0x239   : > { %v5892_v19 = vadd.f32 %v5860_v29, %v5724_v11  ;;  %v2643_v41 = vpop.f32.mrb[25].mxu1  ;;  %v5861_v52 = vpop.f32.mrb[26].mxu0 }
 0x23a   : > { %v5893_v2 = vadd.f32 %v4668_v24, %v2643_v41  ;;  %v5725_v39 = vpop.f32.mrb[26].mxu1  ;;  %v4671_v0 = vpop.f32.mrb[27].mxu0 }
 0x23b   : > { %v5894_v36 = vadd.f32 %v5861_v52, %v5725_v39  ;;  %v2646_v10 = vpop.f32.mrb[27].mxu1  ;;  %4743 = vxpose.xlu0.b32.cont [13/16] (narrow) %v5881_v46, 8 }
 0x23c   : > { %v5895_v59 = vadd.f32 %v4671_v0, %v2646_v10  ;;  %4767 = vxpose.xlu1.b32.cont [5/16] (narrow) %v5889_v58, 8 }
 0x23f   : > { %v5864_v38 = vpop.f32.mrb[28].mxu0  ;;  %4744 = vxpose.xlu0.b32.cont [14/16] (narrow) %v5883_v42, 8 }
 0x240   : > { %4768 = vxpose.xlu1.b32.cont [6/16] (narrow) %v5891_v55, 8  ;;  %v5728_v37 = vpop.f32.mrb[28].mxu1  ;;  %v4684_v26 = vpop.f32.mrb[29].mxu0 }
 0x241   : > { %v5896_v35 = vadd.f32 %v5864_v38, %v5728_v37  ;;  %v2659_v34 = vpop.f32.mrb[29].mxu1  ;;  %v5865_v6 = vpop.f32.mrb[30].mxu0 }
 0x242   : > { %v5897_v49 = vadd.f32 %v4684_v26, %v2659_v34  ;;  %v5729_v23 = vpop.f32.mrb[30].mxu1  ;;  %v4687_v25 = vpop.f32.mrb[31].mxu0 }
 0x243   : > { %v5898_v1 = vadd.f32 %v5865_v6, %v5729_v23  ;;  %v2662_v7 = vpop.f32.mrb[31].mxu1  ;;  %4745 = vxpose.xlu0.b32.cont [15/16] (narrow) %v7995_v21, 8 }
 0x244   : > { %v5899_v61 = vadd.f32 %v4687_v25, %v2662_v7  ;;  %4769 = vxpose.xlu1.b32.cont [7/16] (narrow) %v5888_v43, 8 }
 0x247   : > { %4746 = vxpose.xlu0.b32.end [16/16] (narrow) %v7997_v60, 8 }
 0x248   : > { %4770 = vxpose.xlu1.b32.cont [8/16] (narrow) %v5890_v18, 8 }
 0x24c   : > { %4771 = vxpose.xlu1.b32.cont [9/16] (narrow) %v5893_v2, 8 }
 0x250   : > { %4772 = vxpose.xlu1.b32.cont [10/16] (narrow) %v5895_v59, 8 }
 0x254   : > { %4773 = vxpose.xlu1.b32.cont [11/16] (narrow) %v5892_v19, 8 }
 0x258   : > { %4774 = vxpose.xlu1.b32.cont [12/16] (narrow) %v5894_v36, 8 }
 0x25c   : > { %4775 = vxpose.xlu1.b32.cont [13/16] (narrow) %v5897_v49, 8 }
 0x260   : > { %4776 = vxpose.xlu1.b32.cont [14/16] (narrow) %v5899_v61, 8 }
 0x264   : > { %4777 = vxpose.xlu1.b32.cont [15/16] (narrow) %v5896_v35, 8 }
 0x268   : > { %4778 = vxpose.xlu1.b32.end [16/16] (narrow) %v5898_v1, 8 }
 0x270   : > { %6145 = vset.pattern.permute.xlu0 %v6259_v63 }
 0x28b   : > { %v4747_v44 = vpop.trf.xlu0 }
 0x28c   : > { %v4801_v3 = vadd.f32 %v4799_v22, %v4747_v44 }
 0x28e   : > { %4803 = vst [vmem:[%s170_s20] sm:$0xff] %v4801_v3 }
 0x2ac   : > { %v4779_v51 = vpop.trf.xlu1 }
 0x2ad   : > { %v4802_v28 = vadd.f32 %v4799_v22, %v4779_v51 }
 0x2af   : > { %4804 = vst [vmem:[%s170_s20 + $0x8] sm:$0xff] %v4802_v28 }
 0x2b0 PF: > { %s13_s12 = sadd.s32 1, %s6257_s12  }
 0x2b1   : > { %p10_p4 = scmp.ge.s32.totalorder %s13_s12, 4  }
 0x2b3   :  { %12 = sbr.rel (!%p10_p4) target bundleno = 1 (0x1), region = 72 }

</bundles_post_ra>
